<compile_context>
chip_gen: v6e
topology: v6e:2x2x1
jax: 0.10.0
libtpu: 0.0.40
codegen_flags: <defaults>
</compile_context>

<pallas_src>
import jax
import jax.numpy as jnp
from jax.experimental import pallas as pl
from jax.experimental.pallas import tpu as pltpu


def _rnn2_kernel(x_ref, h0_ref, c0_ref,
                 w12_ref, b12_ref,
                 wih_ref, bl_ref, whh_ref,
                 wo_ref, bo_ref,
                 out_ref, hn_ref, cn_ref,
                 xg_sc, hs_sc):
    Bp, H4 = h0_ref.shape          # padded batch, 4*hidden (= lane width here)
    H = H4 // 4
    T = x_ref.shape[0] // Bp

    # ---- Time-parallel prework: folded conv + tanh, then input->gate proj --
    x = x_ref[...]                                                  # (T*Bp, I)
    p = jnp.tanh(jnp.dot(x, w12_ref[...],
                         preferred_element_type=jnp.float32) + b12_ref[...])
    # Stage the gate projection (+ fused LSTM biases) in VMEM scratch so it is
    # not held live in vregs across the whole unrolled recurrence.
    xg_sc[...] = (jnp.dot(p, wih_ref[...],
                          preferred_element_type=jnp.float32) + bl_ref[...])

    # Hoisted lane mask: the "g" gate (lanes [2H, 3H)) uses tanh, rest sigmoid.
    lane = jax.lax.broadcasted_iota(jnp.int32, (Bp, H4), 1)
    g_lanes = (lane >= 2 * H) & (lane < 3 * H)

    # Wide hidden/cell state: valid data lives in lanes [0, H); lanes [H, 4H)
    # carry bounded don't-care values that are annihilated by the zero rows
    # [H, 4H) of the padded recurrent / output weight matrices.
    h = h0_ref[...]                                                 # (Bp, 4H)
    c = c0_ref[...]
    whh = whh_ref[...]                                              # (4H, 4H)

    # ---- Serial recurrence (fully unrolled; all indices are static) --------
    for t in range(T):
        r0 = t * Bp
        g = xg_sc[r0:r0 + Bp, :] + jnp.dot(
            h, whh, preferred_element_type=jnp.float32)             # (Bp, 4H)
        # Two full-width EUP passes + one select instead of four 32-lane ones.
        sig = jax.nn.sigmoid(g)
        th = jnp.tanh(g)
        act = jnp.where(g_lanes, th, sig)        # lanes: [ i | f | g~ | o ]
        # pltpu.roll == jnp.roll: out[:, j] = in[:, (j - shift) mod 4H], so a
        # positive shift of (4H - k) brings lane k to lane 0.  These run on
        # the XLU, off the VPU/EUP slots.
        f_al = pltpu.roll(act, 3 * H, 1)         # f  -> lanes [0, H)
        gg_al = pltpu.roll(act, 2 * H, 1)        # g~ -> lanes [0, H)
        o_al = pltpu.roll(act, 1 * H, 1)         # o  -> lanes [0, H)
        c = f_al * c + act * gg_al               # lanes [0,H): f*c + i*g~
        h = o_al * jnp.tanh(c)                   # lanes [0,H): o*tanh(c)
        hs_sc[r0:r0 + Bp, :] = h                 # lane-dense, sublane-aligned

    hn_ref[...] = h
    cn_ref[...] = c

    # ---- Output Linear + tanh: one (T*Bp, 4H) @ (4H, 128) matmul, one store -
    out_ref[...] = jnp.tanh(
        jnp.dot(hs_sc[...], wo_ref[...],
                preferred_element_type=jnp.float32) + bo_ref[...])


def rnn2_forward(inputs, hidden, params):
    """inputs: (T, B, input_size); hidden: (h0, c0) each (n_layers=1, B, H)."""
    h0, c0 = hidden
    T, B, I = inputs.shape
    H = params["w_hh"].shape[0]
    O = params["w_out"].shape[1]
    H4 = 4 * H
    f32 = jnp.float32
    hi = jax.lax.Precision.HIGHEST

    SUB, LANE = 8, 128
    Bp = -(-B // SUB) * SUB            # pad batch to sublane height
    Op = -(-O // LANE) * LANE          # pad output features to lane width

    # ---- Wrapper-side algebra & layout plumbing (free / one-time) ----------
    # Fold conv1 -> conv2 (no nonlinearity in between): exact up to rounding.
    w12 = jnp.dot(params["w1"], params["w2"], precision=hi)          # (I, H)
    b12 = (jnp.dot(params["b1"], params["w2"], precision=hi)
           + params["b2"]).reshape(1, H)
    bl = (params["b_ih"] + params["b_hh"]).reshape(1, H4)

    # Pad batch with zero rows (row-independent network => padded rows inert).
    x_pad = jnp.zeros((T, Bp, I), f32).at[:, :B, :].set(inputs)
    x2d = x_pad.reshape(T * Bp, I)

    # Wide (4H-lane) initial states: valid data in lanes [0, H), zeros beyond.
    h0w = jnp.zeros((Bp, H4), f32).at[:B, :H].set(h0[0])
    c0w = jnp.zeros((Bp, H4), f32).at[:B, :H].set(c0[0])

    # Zero rows [H, 4H) kill the wide state's don't-care lanes in the matmuls;
    # zero-padded output columns give a lane-dense (128-wide) output slab.
    whh_w = jnp.zeros((H4, H4), f32).at[:H, :].set(params["w_hh"])
    wo_w = jnp.zeros((H4, Op), f32).at[:H, :O].set(params["w_out"])
    bo_w = jnp.zeros((1, Op), f32).at[0, :O].set(params["b_out"])

    vmem = lambda: pl.BlockSpec(memory_space=pltpu.MemorySpace.VMEM)

    out_w, hn_w, cn_w = pl.pallas_call(
        _rnn2_kernel,
        out_shape=(
            jax.ShapeDtypeStruct((T * Bp, Op), f32),   # lane-dense output slab
            jax.ShapeDtypeStruct((Bp, H4), f32),       # wide h_n
            jax.ShapeDtypeStruct((Bp, H4), f32),       # wide c_n
        ),
        in_specs=[vmem() for _ in range(10)],
        out_specs=(vmem(), vmem(), vmem()),
        scratch_shapes=[pltpu.VMEM((T * Bp, H4), f32),   # xg staging
                        pltpu.VMEM((T * Bp, H4), f32)],  # per-step h slab
    )(x2d, h0w, c0w, w12, b12, params["w_ih"], bl, whh_w, wo_w, bo_w)

    out = out_w[:, :O].reshape(T, Bp, O)[:, :B, :]
    h_n = hn_w[:B, :H][None]
    c_n = cn_w[:B, :H][None]
    return out, (h_n, c_n)


def _reference_forward(inputs, hidden, params):
    """Pure-JAX reference matching PyTorch semantics (unfolded convs)."""
    hi = jax.lax.Precision.HIGHEST
    h0, c0 = hidden
    H = params["w_hh"].shape[0]
    c1 = jnp.dot(inputs, params["w1"], precision=hi) + params["b1"]
    p = jnp.tanh(jnp.dot(c1, params["w2"], precision=hi) + params["b2"])

    def step(carry, x_t):
        h, c = carry
        g = (jnp.dot(x_t, params["w_ih"], precision=hi)
             + jnp.dot(h, params["w_hh"], precision=hi)
             + params["b_ih"] + params["b_hh"])
        i = jax.nn.sigmoid(g[:, 0 * H:1 * H])
        f = jax.nn.sigmoid(g[:, 1 * H:2 * H])
        gg = jnp.tanh(g[:, 2 * H:3 * H])
        o = jax.nn.sigmoid(g[:, 3 * H:4 * H])
        c_new = f * c + i * gg
        h_new = o * jnp.tanh(c_new)
        return (h_new, c_new), h_new

    (h_n, c_n), hs = jax.lax.scan(step, (h0[0], c0[0]), p)
    out = jnp.tanh(jnp.dot(hs, params["w_out"], precision=hi) + params["b_out"])
    return out, (h_n[None], c_n[None])


def init_params(key, input_size, hidden_size, output_size):
    ks = jax.random.split(key, 10)
    s = 0.1
    return {
        "w1": s * jax.random.normal(ks[0], (input_size, hidden_size), jnp.float32),
        "b1": s * jax.random.normal(ks[1], (hidden_size,), jnp.float32),
        "w2": s * jax.random.normal(ks[2], (hidden_size, hidden_size), jnp.float32),
        "b2": s * jax.random.normal(ks[3], (hidden_size,), jnp.float32),
        # LSTM weights stored transposed: (in, 4H), gate order [i, f, g, o]
        "w_ih": s * jax.random.normal(ks[4], (hidden_size, 4 * hidden_size), jnp.float32),
        "w_hh": s * jax.random.normal(ks[5], (hidden_size, 4 * hidden_size), jnp.float32),
        "b_ih": s * jax.random.normal(ks[6], (4 * hidden_size,), jnp.float32),
        "b_hh": s * jax.random.normal(ks[7], (4 * hidden_size,), jnp.float32),
        "w_out": s * jax.random.normal(ks[8], (hidden_size, output_size), jnp.float32),
        "b_out": s * jax.random.normal(ks[9], (output_size,), jnp.float32),
    }


if __name__ == "__main__":
    input_size, hidden_size, output_size, n_layers = 16, 32, 8, 1
    seq_len, batch = 8, 4

    key = jax.random.PRNGKey(0)
    k_in, k_h, k_c, k_p = jax.random.split(key, 4)

    inputs = jax.random.normal(k_in, (seq_len, batch, input_size), jnp.float32)
    h0 = jax.random.normal(k_h, (n_layers, batch, hidden_size), jnp.float32)
    c0 = jax.random.normal(k_c, (n_layers, batch, hidden_size), jnp.float32)
    params = init_params(k_p, input_size, hidden_size, output_size)

    out, (h_n, c_n) = rnn2_forward(inputs, (h0, c0), params)
    jax.block_until_ready((out, h_n, c_n))

    ref_out, (ref_h, ref_c) = _reference_forward(inputs, (h0, c0), params)
    assert out.shape == (seq_len, batch, output_size)
    assert h_n.shape == (n_layers, batch, hidden_size)
    assert c_n.shape == (n_layers, batch, hidden_size)
    assert jnp.allclose(out, ref_out, rtol=1e-4, atol=1e-4)
    assert jnp.allclose(h_n, ref_h, rtol=1e-4, atol=1e-4)
    assert jnp.allclose(c_n, ref_c, rtol=1e-4, atol=1e-4)

    print("KERNEL_OK")
</pallas_src>

<mosaic_0001>
module attributes {stable_mosaic.version = 11 : i64} {
  func.func @_rnn2_kernel(%arg0: memref<64x16xf32, #tpu.memory_space<vmem>>, %arg1: memref<8x128xf32, #tpu.memory_space<vmem>>, %arg2: memref<8x128xf32, #tpu.memory_space<vmem>>, %arg3: memref<16x32xf32, #tpu.memory_space<vmem>>, %arg4: memref<1x32xf32, #tpu.memory_space<vmem>>, %arg5: memref<32x128xf32, #tpu.memory_space<vmem>>, %arg6: memref<1x128xf32, #tpu.memory_space<vmem>>, %arg7: memref<128x128xf32, #tpu.memory_space<vmem>>, %arg8: memref<128x128xf32, #tpu.memory_space<vmem>>, %arg9: memref<1x128xf32, #tpu.memory_space<vmem>>, %arg10: memref<64x128xf32, #tpu.memory_space<vmem>>, %arg11: memref<8x128xf32, #tpu.memory_space<vmem>>, %arg12: memref<8x128xf32, #tpu.memory_space<vmem>>, %arg13: memref<64x128xf32, #tpu.memory_space<vmem>>, %arg14: memref<64x128xf32, #tpu.memory_space<vmem>>) attributes {dimension_semantics = [], scalar_prefetch = 0 : i64, scratch_operands = 2 : i64, tpu.core_type = #tpu.core_type<tc>} {
    %c0 = arith.constant 0 : index
    %c0_0 = arith.constant 0 : index
    %0 = vector.load %arg0[%c0, %c0_0] : memref<64x16xf32, #tpu.memory_space<vmem>>, vector<64x16xf32>
    %c0_1 = arith.constant 0 : index
    %c0_2 = arith.constant 0 : index
    %1 = vector.load %arg3[%c0_1, %c0_2] : memref<16x32xf32, #tpu.memory_space<vmem>>, vector<16x32xf32>
    %cst = arith.constant dense<0.000000e+00> : vector<64x32xf32>
    %2 = tpu.matmul %0, %1, %cst {dimension_numbers = #tpu.dot_dimension_numbers<[1], [0], [0], [1], [0, 0, 1, 1], [], []>} : vector<64x16xf32>, vector<16x32xf32>, vector<64x32xf32> -> vector<64x32xf32>
    %c0_3 = arith.constant 0 : index
    %c0_4 = arith.constant 0 : index
    %3 = vector.load %arg4[%c0_3, %c0_4] : memref<1x32xf32, #tpu.memory_space<vmem>>, vector<1x32xf32>
    %4 = vector.broadcast %3 : vector<1x32xf32> to vector<64x32xf32>
    %5 = arith.addf %2, %4 : vector<64x32xf32>
    %6 = math.tanh %5 : vector<64x32xf32>
    %c0_5 = arith.constant 0 : index
    %c0_6 = arith.constant 0 : index
    %7 = vector.load %arg5[%c0_5, %c0_6] : memref<32x128xf32, #tpu.memory_space<vmem>>, vector<32x128xf32>
    %cst_7 = arith.constant dense<0.000000e+00> : vector<64x128xf32>
    %8 = tpu.matmul %6, %7, %cst_7 {dimension_numbers = #tpu.dot_dimension_numbers<[1], [0], [0], [1], [0, 0, 1, 1], [], []>} : vector<64x32xf32>, vector<32x128xf32>, vector<64x128xf32> -> vector<64x128xf32>
    %c0_8 = arith.constant 0 : index
    %c0_9 = arith.constant 0 : index
    %9 = vector.load %arg6[%c0_8, %c0_9] : memref<1x128xf32, #tpu.memory_space<vmem>>, vector<1x128xf32>
    %10 = vector.broadcast %9 : vector<1x128xf32> to vector<64x128xf32>
    %11 = arith.addf %8, %10 : vector<64x128xf32>
    %c0_10 = arith.constant 0 : index
    %c0_11 = arith.constant 0 : index
    %12 = vector.load %arg13[%c0_10, %c0_11] : memref<64x128xf32, #tpu.memory_space<vmem>>, vector<64x128xf32>
    tpu.vector_store %arg13[%c0_10, %c0_11], %11 {strides = array<i32>} : memref<64x128xf32, #tpu.memory_space<vmem>>, vector<64x128xf32>,
    %13 = tpu.iota {dimensions = array<i32: 1>} : vector<8x128xi32>
    %c64_i32 = arith.constant 64 : i32
    %14 = vector.broadcast %c64_i32 : i32 to vector<8x128xi32>
    %15 = arith.cmpi sge, %13, %14 : vector<8x128xi32>
    %c96_i32 = arith.constant 96 : i32
    %16 = vector.broadcast %c96_i32 : i32 to vector<8x128xi32>
    %17 = arith.cmpi slt, %13, %16 : vector<8x128xi32>
    %18 = arith.andi %15, %17 : vector<8x128xi1>
    %c0_12 = arith.constant 0 : index
    %c0_13 = arith.constant 0 : index
    %19 = vector.load %arg1[%c0_12, %c0_13] : memref<8x128xf32, #tpu.memory_space<vmem>>, vector<8x128xf32>
    %c0_14 = arith.constant 0 : index
    %c0_15 = arith.constant 0 : index
    %20 = vector.load %arg2[%c0_14, %c0_15] : memref<8x128xf32, #tpu.memory_space<vmem>>, vector<8x128xf32>
    %c0_16 = arith.constant 0 : index
    %c0_17 = arith.constant 0 : index
    %21 = vector.load %arg7[%c0_16, %c0_17] : memref<128x128xf32, #tpu.memory_space<vmem>>, vector<128x128xf32>
    %c0_18 = arith.constant 0 : index
    %c0_19 = arith.constant 0 : index
    %22 = vector.load %arg13[%c0_18, %c0_19] : memref<64x128xf32, #tpu.memory_space<vmem>>, vector<8x128xf32>
    %cst_20 = arith.constant dense<0.000000e+00> : vector<8x128xf32>
    %23 = tpu.matmul %19, %21, %cst_20 {dimension_numbers = #tpu.dot_dimension_numbers<[1], [0], [0], [1], [0, 0, 1, 1], [], []>} : vector<8x128xf32>, vector<128x128xf32>, vector<8x128xf32> -> vector<8x128xf32>
    %24 = arith.addf %22, %23 : vector<8x128xf32>
    %25 = arith.negf %24 : vector<8x128xf32>
    %26 = math.exp %25 : vector<8x128xf32>
    %cst_21 = arith.constant 1.000000e+00 : f32
    %27 = vector.broadcast %cst_21 : f32 to vector<8x128xf32>
    %28 = arith.addf %27, %26 : vector<8x128xf32>
    %29 = arith.divf %27, %28 : vector<8x128xf32>
    %30 = math.tanh %24 : vector<8x128xf32>
    %31 = arith.select %18, %30, %29 : vector<8x128xi1>, vector<8x128xf32>
    %c96_i32_22 = arith.constant 96 : i32
    %32 = tpu.dynamic_rotate %31 by %c96_i32_22 dim 1 : vector<8x128xf32>, i32 -> vector<8x128xf32>
    %c64_i32_23 = arith.constant 64 : i32
    %33 = tpu.dynamic_rotate %31 by %c64_i32_23 dim 1 : vector<8x128xf32>, i32 -> vector<8x128xf32>
    %c32_i32 = arith.constant 32 : i32
    %34 = tpu.dynamic_rotate %31 by %c32_i32 dim 1 : vector<8x128xf32>, i32 -> vector<8x128xf32>
    %35 = arith.mulf %32, %20 : vector<8x128xf32>
    %36 = arith.mulf %31, %33 : vector<8x128xf32>
    %37 = arith.addf %35, %36 : vector<8x128xf32>
    %38 = math.tanh %37 : vector<8x128xf32>
    %39 = arith.mulf %34, %38 : vector<8x128xf32>
    %c0_24 = arith.constant 0 : index
    %c0_25 = arith.constant 0 : index
    %40 = vector.load %arg14[%c0_24, %c0_25] : memref<64x128xf32, #tpu.memory_space<vmem>>, vector<8x128xf32>
    tpu.vector_store %arg14[%c0_24, %c0_25], %39 {strides = array<i32>} : memref<64x128xf32, #tpu.memory_space<vmem>>, vector<8x128xf32>,
    %c8 = arith.constant 8 : index
    %c0_26 = arith.constant 0 : index
    %41 = vector.load %arg13[%c8, %c0_26] : memref<64x128xf32, #tpu.memory_space<vmem>>, vector<8x128xf32>
    %cst_27 = arith.constant dense<0.000000e+00> : vector<8x128xf32>
    %42 = tpu.matmul %39, %21, %cst_27 {dimension_numbers = #tpu.dot_dimension_numbers<[1], [0], [0], [1], [0, 0, 1, 1], [], []>} : vector<8x128xf32>, vector<128x128xf32>, vector<8x128xf32> -> vector<8x128xf32>
    %43 = arith.addf %41, %42 : vector<8x128xf32>
    %44 = arith.negf %43 : vector<8x128xf32>
    %45 = math.exp %44 : vector<8x128xf32>
    %cst_28 = arith.constant 1.000000e+00 : f32
    %46 = vector.broadcast %cst_28 : f32 to vector<8x128xf32>
    %47 = arith.addf %46, %45 : vector<8x128xf32>
    %48 = arith.divf %46, %47 : vector<8x128xf32>
    %49 = math.tanh %43 : vector<8x128xf32>
    %50 = arith.select %18, %49, %48 : vector<8x128xi1>, vector<8x128xf32>
    %c96_i32_29 = arith.constant 96 : i32
    %51 = tpu.dynamic_rotate %50 by %c96_i32_29 dim 1 : vector<8x128xf32>, i32 -> vector<8x128xf32>
    %c64_i32_30 = arith.constant 64 : i32
    %52 = tpu.dynamic_rotate %50 by %c64_i32_30 dim 1 : vector<8x128xf32>, i32 -> vector<8x128xf32>
    %c32_i32_31 = arith.constant 32 : i32
    %53 = tpu.dynamic_rotate %50 by %c32_i32_31 dim 1 : vector<8x128xf32>, i32 -> vector<8x128xf32>
    %54 = arith.mulf %51, %37 : vector<8x128xf32>
    %55 = arith.mulf %50, %52 : vector<8x128xf32>
    %56 = arith.addf %54, %55 : vector<8x128xf32>
    %57 = math.tanh %56 : vector<8x128xf32>
    %58 = arith.mulf %53, %57 : vector<8x128xf32>
    %c8_32 = arith.constant 8 : index
    %c0_33 = arith.constant 0 : index
    %59 = vector.load %arg14[%c8_32, %c0_33] : memref<64x128xf32, #tpu.memory_space<vmem>>, vector<8x128xf32>
    tpu.vector_store %arg14[%c8_32, %c0_33], %58 {strides = array<i32>} : memref<64x128xf32, #tpu.memory_space<vmem>>, vector<8x128xf32>,
    %c16 = arith.constant 16 : index
    %c0_34 = arith.constant 0 : index
    %60 = vector.load %arg13[%c16, %c0_34] : memref<64x128xf32, #tpu.memory_space<vmem>>, vector<8x128xf32>
    %cst_35 = arith.constant dense<0.000000e+00> : vector<8x128xf32>
    %61 = tpu.matmul %58, %21, %cst_35 {dimension_numbers = #tpu.dot_dimension_numbers<[1], [0], [0], [1], [0, 0, 1, 1], [], []>} : vector<8x128xf32>, vector<128x128xf32>, vector<8x128xf32> -> vector<8x128xf32>
    %62 = arith.addf %60, %61 : vector<8x128xf32>
    %63 = arith.negf %62 : vector<8x128xf32>
    %64 = math.exp %63 : vector<8x128xf32>
    %cst_36 = arith.constant 1.000000e+00 : f32
    %65 = vector.broadcast %cst_36 : f32 to vector<8x128xf32>
    %66 = arith.addf %65, %64 : vector<8x128xf32>
    %67 = arith.divf %65, %66 : vector<8x128xf32>
    %68 = math.tanh %62 : vector<8x128xf32>
    %69 = arith.select %18, %68, %67 : vector<8x128xi1>, vector<8x128xf32>
    %c96_i32_37 = arith.constant 96 : i32
    %70 = tpu.dynamic_rotate %69 by %c96_i32_37 dim 1 : vector<8x128xf32>, i32 -> vector<8x128xf32>
    %c64_i32_38 = arith.constant 64 : i32
    %71 = tpu.dynamic_rotate %69 by %c64_i32_38 dim 1 : vector<8x128xf32>, i32 -> vector<8x128xf32>
    %c32_i32_39 = arith.constant 32 : i32
    %72 = tpu.dynamic_rotate %69 by %c32_i32_39 dim 1 : vector<8x128xf32>, i32 -> vector<8x128xf32>
    %73 = arith.mulf %70, %56 : vector<8x128xf32>
    %74 = arith.mulf %69, %71 : vector<8x128xf32>
    %75 = arith.addf %73, %74 : vector<8x128xf32>
    %76 = math.tanh %75 : vector<8x128xf32>
    %77 = arith.mulf %72, %76 : vector<8x128xf32>
    %c16_40 = arith.constant 16 : index
    %c0_41 = arith.constant 0 : index
    %78 = vector.load %arg14[%c16_40, %c0_41] : memref<64x128xf32, #tpu.memory_space<vmem>>, vector<8x128xf32>
    tpu.vector_store %arg14[%c16_40, %c0_41], %77 {strides = array<i32>} : memref<64x128xf32, #tpu.memory_space<vmem>>, vector<8x128xf32>,
    %c24 = arith.constant 24 : index
    %c0_42 = arith.constant 0 : index
    %79 = vector.load %arg13[%c24, %c0_42] : memref<64x128xf32, #tpu.memory_space<vmem>>, vector<8x128xf32>
    %cst_43 = arith.constant dense<0.000000e+00> : vector<8x128xf32>
    %80 = tpu.matmul %77, %21, %cst_43 {dimension_numbers = #tpu.dot_dimension_numbers<[1], [0], [0], [1], [0, 0, 1, 1], [], []>} : vector<8x128xf32>, vector<128x128xf32>, vector<8x128xf32> -> vector<8x128xf32>
    %81 = arith.addf %79, %80 : vector<8x128xf32>
    %82 = arith.negf %81 : vector<8x128xf32>
    %83 = math.exp %82 : vector<8x128xf32>
    %cst_44 = arith.constant 1.000000e+00 : f32
    %84 = vector.broadcast %cst_44 : f32 to vector<8x128xf32>
    %85 = arith.addf %84, %83 : vector<8x128xf32>
    %86 = arith.divf %84, %85 : vector<8x128xf32>
    %87 = math.tanh %81 : vector<8x128xf32>
    %88 = arith.select %18, %87, %86 : vector<8x128xi1>, vector<8x128xf32>
    %c96_i32_45 = arith.constant 96 : i32
    %89 = tpu.dynamic_rotate %88 by %c96_i32_45 dim 1 : vector<8x128xf32>, i32 -> vector<8x128xf32>
    %c64_i32_46 = arith.constant 64 : i32
    %90 = tpu.dynamic_rotate %88 by %c64_i32_46 dim 1 : vector<8x128xf32>, i32 -> vector<8x128xf32>
    %c32_i32_47 = arith.constant 32 : i32
    %91 = tpu.dynamic_rotate %88 by %c32_i32_47 dim 1 : vector<8x128xf32>, i32 -> vector<8x128xf32>
    %92 = arith.mulf %89, %75 : vector<8x128xf32>
    %93 = arith.mulf %88, %90 : vector<8x128xf32>
    %94 = arith.addf %92, %93 : vector<8x128xf32>
    %95 = math.tanh %94 : vector<8x128xf32>
    %96 = arith.mulf %91, %95 : vector<8x128xf32>
    %c24_48 = arith.constant 24 : index
    %c0_49 = arith.constant 0 : index
    %97 = vector.load %arg14[%c24_48, %c0_49] : memref<64x128xf32, #tpu.memory_space<vmem>>, vector<8x128xf32>
    tpu.vector_store %arg14[%c24_48, %c0_49], %96 {strides = array<i32>} : memref<64x128xf32, #tpu.memory_space<vmem>>, vector<8x128xf32>,
    %c32 = arith.constant 32 : index
    %c0_50 = arith.constant 0 : index
    %98 = vector.load %arg13[%c32, %c0_50] : memref<64x128xf32, #tpu.memory_space<vmem>>, vector<8x128xf32>
    %cst_51 = arith.constant dense<0.000000e+00> : vector<8x128xf32>
    %99 = tpu.matmul %96, %21, %cst_51 {dimension_numbers = #tpu.dot_dimension_numbers<[1], [0], [0], [1], [0, 0, 1, 1], [], []>} : vector<8x128xf32>, vector<128x128xf32>, vector<8x128xf32> -> vector<8x128xf32>
    %100 = arith.addf %98, %99 : vector<8x128xf32>
    %101 = arith.negf %100 : vector<8x128xf32>
    %102 = math.exp %101 : vector<8x128xf32>
    %cst_52 = arith.constant 1.000000e+00 : f32
    %103 = vector.broadcast %cst_52 : f32 to vector<8x128xf32>
    %104 = arith.addf %103, %102 : vector<8x128xf32>
    %105 = arith.divf %103, %104 : vector<8x128xf32>
    %106 = math.tanh %100 : vector<8x128xf32>
    %107 = arith.select %18, %106, %105 : vector<8x128xi1>, vector<8x128xf32>
    %c96_i32_53 = arith.constant 96 : i32
    %108 = tpu.dynamic_rotate %107 by %c96_i32_53 dim 1 : vector<8x128xf32>, i32 -> vector<8x128xf32>
    %c64_i32_54 = arith.constant 64 : i32
    %109 = tpu.dynamic_rotate %107 by %c64_i32_54 dim 1 : vector<8x128xf32>, i32 -> vector<8x128xf32>
    %c32_i32_55 = arith.constant 32 : i32
    %110 = tpu.dynamic_rotate %107 by %c32_i32_55 dim 1 : vector<8x128xf32>, i32 -> vector<8x128xf32>
    %111 = arith.mulf %108, %94 : vector<8x128xf32>
    %112 = arith.mulf %107, %109 : vector<8x128xf32>
    %113 = arith.addf %111, %112 : vector<8x128xf32>
    %114 = math.tanh %113 : vector<8x128xf32>
    %115 = arith.mulf %110, %114 : vector<8x128xf32>
    %c32_56 = arith.constant 32 : index
    %c0_57 = arith.constant 0 : index
    %116 = vector.load %arg14[%c32_56, %c0_57] : memref<64x128xf32, #tpu.memory_space<vmem>>, vector<8x128xf32>
    tpu.vector_store %arg14[%c32_56, %c0_57], %115 {strides = array<i32>} : memref<64x128xf32, #tpu.memory_space<vmem>>, vector<8x128xf32>,
    %c40 = arith.constant 40 : index
    %c0_58 = arith.constant 0 : index
    %117 = vector.load %arg13[%c40, %c0_58] : memref<64x128xf32, #tpu.memory_space<vmem>>, vector<8x128xf32>
    %cst_59 = arith.constant dense<0.000000e+00> : vector<8x128xf32>
    %118 = tpu.matmul %115, %21, %cst_59 {dimension_numbers = #tpu.dot_dimension_numbers<[1], [0], [0], [1], [0, 0, 1, 1], [], []>} : vector<8x128xf32>, vector<128x128xf32>, vector<8x128xf32> -> vector<8x128xf32>
    %119 = arith.addf %117, %118 : vector<8x128xf32>
    %120 = arith.negf %119 : vector<8x128xf32>
    %121 = math.exp %120 : vector<8x128xf32>
    %cst_60 = arith.constant 1.000000e+00 : f32
    %122 = vector.broadcast %cst_60 : f32 to vector<8x128xf32>
    %123 = arith.addf %122, %121 : vector<8x128xf32>
    %124 = arith.divf %122, %123 : vector<8x128xf32>
    %125 = math.tanh %119 : vector<8x128xf32>
    %126 = arith.select %18, %125, %124 : vector<8x128xi1>, vector<8x128xf32>
    %c96_i32_61 = arith.constant 96 : i32
    %127 = tpu.dynamic_rotate %126 by %c96_i32_61 dim 1 : vector<8x128xf32>, i32 -> vector<8x128xf32>
    %c64_i32_62 = arith.constant 64 : i32
    %128 = tpu.dynamic_rotate %126 by %c64_i32_62 dim 1 : vector<8x128xf32>, i32 -> vector<8x128xf32>
    %c32_i32_63 = arith.constant 32 : i32
    %129 = tpu.dynamic_rotate %126 by %c32_i32_63 dim 1 : vector<8x128xf32>, i32 -> vector<8x128xf32>
    %130 = arith.mulf %127, %113 : vector<8x128xf32>
    %131 = arith.mulf %126, %128 : vector<8x128xf32>
    %132 = arith.addf %130, %131 : vector<8x128xf32>
    %133 = math.tanh %132 : vector<8x128xf32>
    %134 = arith.mulf %129, %133 : vector<8x128xf32>
    %c40_64 = arith.constant 40 : index
    %c0_65 = arith.constant 0 : index
    %135 = vector.load %arg14[%c40_64, %c0_65] : memref<64x128xf32, #tpu.memory_space<vmem>>, vector<8x128xf32>
    tpu.vector_store %arg14[%c40_64, %c0_65], %134 {strides = array<i32>} : memref<64x128xf32, #tpu.memory_space<vmem>>, vector<8x128xf32>,
    %c48 = arith.constant 48 : index
    %c0_66 = arith.constant 0 : index
    %136 = vector.load %arg13[%c48, %c0_66] : memref<64x128xf32, #tpu.memory_space<vmem>>, vector<8x128xf32>
    %cst_67 = arith.constant dense<0.000000e+00> : vector<8x128xf32>
    %137 = tpu.matmul %134, %21, %cst_67 {dimension_numbers = #tpu.dot_dimension_numbers<[1], [0], [0], [1], [0, 0, 1, 1], [], []>} : vector<8x128xf32>, vector<128x128xf32>, vector<8x128xf32> -> vector<8x128xf32>
    %138 = arith.addf %136, %137 : vector<8x128xf32>
    %139 = arith.negf %138 : vector<8x128xf32>
    %140 = math.exp %139 : vector<8x128xf32>
    %cst_68 = arith.constant 1.000000e+00 : f32
    %141 = vector.broadcast %cst_68 : f32 to vector<8x128xf32>
    %142 = arith.addf %141, %140 : vector<8x128xf32>
    %143 = arith.divf %141, %142 : vector<8x128xf32>
    %144 = math.tanh %138 : vector<8x128xf32>
    %145 = arith.select %18, %144, %143 : vector<8x128xi1>, vector<8x128xf32>
    %c96_i32_69 = arith.constant 96 : i32
    %146 = tpu.dynamic_rotate %145 by %c96_i32_69 dim 1 : vector<8x128xf32>, i32 -> vector<8x128xf32>
    %c64_i32_70 = arith.constant 64 : i32
    %147 = tpu.dynamic_rotate %145 by %c64_i32_70 dim 1 : vector<8x128xf32>, i32 -> vector<8x128xf32>
    %c32_i32_71 = arith.constant 32 : i32
    %148 = tpu.dynamic_rotate %145 by %c32_i32_71 dim 1 : vector<8x128xf32>, i32 -> vector<8x128xf32>
    %149 = arith.mulf %146, %132 : vector<8x128xf32>
    %150 = arith.mulf %145, %147 : vector<8x128xf32>
    %151 = arith.addf %149, %150 : vector<8x128xf32>
    %152 = math.tanh %151 : vector<8x128xf32>
    %153 = arith.mulf %148, %152 : vector<8x128xf32>
    %c48_72 = arith.constant 48 : index
    %c0_73 = arith.constant 0 : index
    %154 = vector.load %arg14[%c48_72, %c0_73] : memref<64x128xf32, #tpu.memory_space<vmem>>, vector<8x128xf32>
    tpu.vector_store %arg14[%c48_72, %c0_73], %153 {strides = array<i32>} : memref<64x128xf32, #tpu.memory_space<vmem>>, vector<8x128xf32>,
    %c56 = arith.constant 56 : index
    %c0_74 = arith.constant 0 : index
    %155 = vector.load %arg13[%c56, %c0_74] : memref<64x128xf32, #tpu.memory_space<vmem>>, vector<8x128xf32>
    %cst_75 = arith.constant dense<0.000000e+00> : vector<8x128xf32>
    %156 = tpu.matmul %153, %21, %cst_75 {dimension_numbers = #tpu.dot_dimension_numbers<[1], [0], [0], [1], [0, 0, 1, 1], [], []>} : vector<8x128xf32>, vector<128x128xf32>, vector<8x128xf32> -> vector<8x128xf32>
    %157 = arith.addf %155, %156 : vector<8x128xf32>
    %158 = arith.negf %157 : vector<8x128xf32>
    %159 = math.exp %158 : vector<8x128xf32>
    %cst_76 = arith.constant 1.000000e+00 : f32
    %160 = vector.broadcast %cst_76 : f32 to vector<8x128xf32>
    %161 = arith.addf %160, %159 : vector<8x128xf32>
    %162 = arith.divf %160, %161 : vector<8x128xf32>
    %163 = math.tanh %157 : vector<8x128xf32>
    %164 = arith.select %18, %163, %162 : vector<8x128xi1>, vector<8x128xf32>
    %c96_i32_77 = arith.constant 96 : i32
    %165 = tpu.dynamic_rotate %164 by %c96_i32_77 dim 1 : vector<8x128xf32>, i32 -> vector<8x128xf32>
    %c64_i32_78 = arith.constant 64 : i32
    %166 = tpu.dynamic_rotate %164 by %c64_i32_78 dim 1 : vector<8x128xf32>, i32 -> vector<8x128xf32>
    %c32_i32_79 = arith.constant 32 : i32
    %167 = tpu.dynamic_rotate %164 by %c32_i32_79 dim 1 : vector<8x128xf32>, i32 -> vector<8x128xf32>
    %168 = arith.mulf %165, %151 : vector<8x128xf32>
    %169 = arith.mulf %164, %166 : vector<8x128xf32>
    %170 = arith.addf %168, %169 : vector<8x128xf32>
    %171 = math.tanh %170 : vector<8x128xf32>
    %172 = arith.mulf %167, %171 : vector<8x128xf32>
    %c56_80 = arith.constant 56 : index
    %c0_81 = arith.constant 0 : index
    %173 = vector.load %arg14[%c56_80, %c0_81] : memref<64x128xf32, #tpu.memory_space<vmem>>, vector<8x128xf32>
    tpu.vector_store %arg14[%c56_80, %c0_81], %172 {strides = array<i32>} : memref<64x128xf32, #tpu.memory_space<vmem>>, vector<8x128xf32>,
    %c0_82 = arith.constant 0 : index
    %c0_83 = arith.constant 0 : index
    %174 = vector.load %arg11[%c0_82, %c0_83] : memref<8x128xf32, #tpu.memory_space<vmem>>, vector<8x128xf32>
    tpu.vector_store %arg11[%c0_82, %c0_83], %172 {strides = array<i32>} : memref<8x128xf32, #tpu.memory_space<vmem>>, vector<8x128xf32>,
    %c0_84 = arith.constant 0 : index
    %c0_85 = arith.constant 0 : index
    %175 = vector.load %arg12[%c0_84, %c0_85] : memref<8x128xf32, #tpu.memory_space<vmem>>, vector<8x128xf32>
    tpu.vector_store %arg12[%c0_84, %c0_85], %170 {strides = array<i32>} : memref<8x128xf32, #tpu.memory_space<vmem>>, vector<8x128xf32>,
    %c0_86 = arith.constant 0 : index
    %c0_87 = arith.constant 0 : index
    %176 = vector.load %arg14[%c0_86, %c0_87] : memref<64x128xf32, #tpu.memory_space<vmem>>, vector<64x128xf32>
    %c0_88 = arith.constant 0 : index
    %c0_89 = arith.constant 0 : index
    %177 = vector.load %arg8[%c0_88, %c0_89] : memref<128x128xf32, #tpu.memory_space<vmem>>, vector<128x128xf32>
    %cst_90 = arith.constant dense<0.000000e+00> : vector<64x128xf32>
    %178 = tpu.matmul %176, %177, %cst_90 {dimension_numbers = #tpu.dot_dimension_numbers<[1], [0], [0], [1], [0, 0, 1, 1], [], []>} : vector<64x128xf32>, vector<128x128xf32>, vector<64x128xf32> -> vector<64x128xf32>
    %c0_91 = arith.constant 0 : index
    %c0_92 = arith.constant 0 : index
    %179 = vector.load %arg9[%c0_91, %c0_92] : memref<1x128xf32, #tpu.memory_space<vmem>>, vector<1x128xf32>
    %180 = vector.broadcast %179 : vector<1x128xf32> to vector<64x128xf32>
    %181 = arith.addf %178, %180 : vector<64x128xf32>
    %182 = math.tanh %181 : vector<64x128xf32>
    %c0_93 = arith.constant 0 : index
    %c0_94 = arith.constant 0 : index
    %183 = vector.load %arg10[%c0_93, %c0_94] : memref<64x128xf32, #tpu.memory_space<vmem>>, vector<64x128xf32>
    tpu.vector_store %arg10[%c0_93, %c0_94], %182 {strides = array<i32>} : memref<64x128xf32, #tpu.memory_space<vmem>>, vector<64x128xf32>,
    return
  }
}

</mosaic_0001>

<bundles_post_ra>
// kernel: tpu_custom_call.1
= control target key start
LH: loop header
LB: loop body
LE: loop exit
PB: predicated region body
PF: predicated region fallthrough
CT: control target
= control target key end

     0   :  { %18 = vsyncpa [#allocation5], 0  ;;  %s2703_s0 = inlined_call_operand.vmem [shape: f32[64,16], index: 0, kind: input, shape index: {}]   ;;  %s2704_s1 = inlined_call_operand.vmem [shape: f32[8,128], index: 1, kind: input, shape index: {}]   ;;  %s2705_s2 = inlined_call_operand.vmem [shape: f32[8,128], index: 2, kind: input, shape index: {}]   ;;  %s2706_s3 = inlined_call_operand.vmem [shape: f32[16,32], index: 3, kind: input, shape index: {}]   ;;  %s2707_s4 = inlined_call_operand.vmem [shape: f32[1,32], index: 4, kind: input, shape index: {}]   ;;  %s2708_s5 = inlined_call_operand.vmem [shape: f32[32,128], index: 5, kind: input, shape index: {}]   ;;  %s2709_s6 = inlined_call_operand.vmem [shape: f32[1,128], index: 6, kind: input, shape index: {}]   ;;  %s2710_s7 = inlined_call_operand.hbm [shape: f32[128,128], index: 7, kind: input, shape index: {}]   ;;  %s2711_s8 = inlined_call_operand.hbm [shape: f32[128,128], index: 8, kind: input, shape index: {}]   ;;  %s2712_s9 = inlined_call_operand.vmem [shape: f32[1,128], index: 9, kind: input, shape index: {}]   ;;  %s2713_s10 = inlined_call_operand.hbm [shape: f32[64,128], index: 10, kind: output, shape index: {0}]   ;;  %s2714_s11 = inlined_call_operand.hbm [shape: f32[8,128], index: 11, kind: output, shape index: {1}]   ;;  %s2715_s12 = inlined_call_operand.hbm [shape: f32[8,128], index: 12, kind: output, shape index: {2}]  }
   0x1   :  { %19 = vsyncpa [#allocation8], 0 }
   0x2   :  { %20 = vsyncpa [#allocation6], 0 }
   0x3   :  { %21 = vsyncpa [#allocation11], 0  ;;  %s2115_s21 = smov [#allocation4]  }
   0x4   :  { %s41_s22 = sshll.u32 %s2115_s21, 4  ;;  %s42_s22 = int_to_ptr.vmem [resolvable:$true] %s41_s22 }
   0x5   :  { %s2015_s23 = scalar_lea.vmem %s42_s22, 2048  ;;  %p2020_p1 = scmp.lt.s32.totalorder %s42_s22, %s42_s22 }
   0x6   :  { %p2016_p0 = scmp.ne.s32.totalorder %s42_s22, %s2015_s23  ;;  %p2021_p2 = scmp.lt.s32.totalorder %s2015_s23, %s2015_s23 }
   0x8   :  { %p2022_p3 = por %p2021_p2, %p2020_p1 }
   0xa   :  { %p2023_p4 = pnand %p2022_p3, %p2016_p0 }
   0xc   :  { %2026 = shalt.err (!%p2023_p4)
}
   0xd   :  { %s2116_s24 = smov 128   ;;  %s2117_s25 = smov 8  }
   0xe   :  { %47 = dma.hbm_to_vmem [thread:$0]  %s2710_s7, 2048, %s42_s22, [#allocation5], %s2116_s24, %s2116_s24, %s2117_s25  }
   0xf   :  { %s2118_s28 = smov [#allocation7]  }
  0x10   :  { %s53_s29 = sshll.u32 %s2118_s28, 4  ;;  %s54_s29 = int_to_ptr.vmem [resolvable:$true] %s53_s29 }
  0x11   :  { %s2035_s30 = scalar_lea.vmem %s54_s29, 2048  ;;  %p2040_p6 = scmp.lt.s32.totalorder %s54_s29, %s54_s29 }
  0x12   :  { %p2036_p5 = scmp.ne.s32.totalorder %s54_s29, %s2035_s30  ;;  %p2041_p7 = scmp.lt.s32.totalorder %s2035_s30, %s2035_s30 }
  0x14   :  { %p2042_p8 = por %p2041_p7, %p2040_p6 }
  0x16   :  { %p2043_p9 = pnand %p2042_p8, %p2036_p5 }
  0x18   :  { %2046 = shalt.err (!%p2043_p9)
}
  0x19   :  { %59 = dma.hbm_to_vmem [thread:$0]  %s2711_s8, 2048, %s54_s29, [#allocation8], %s2116_s24, %s2116_s24, %s2117_s25  }
  0x1a   :  { %2107 = dma.done.wait [#allocation5], 2048  }
  0x1b   :  { %2108 = vsyncadd [#allocation5], 4294965248 }
  0x1c   :  { %2109 = dma.done.wait [#allocation8], 2048  }
  0x1d   :  { %2110 = vsyncadd [#allocation8], 4294965248  ;;  %v2119_v0 = vmov 0.0   ;;  %vm85_vm0 = vcmask 130048   ;;  %v77_v1 = vld [vmem:[%s2706_s3 + $0x8] sm:$0xff]  ;;  %v76_v2 = vld [vmem:[%s2706_s3] sm:$0xff] }
  0x1e   :  { %1575 = vmatprep.subr.mxu1 %v2119_v0  ;;  %v68_v3 = vld [vmem:[%s2703_s0] sm:$0xff]  ;;  %1539 = vmatprep.subr.mxu0 %v77_v1  ;;  %v2215_v4 = vld [vmem:[#allocation4 + $0x78] sm:$0xff]  ;;  %v2217_v5 = vld [vmem:[#allocation4 + $0x70] sm:$0xff]  ;;  %vm2120_vm1 = vmmov 0   ;;  %vm234_vm2 = vcmask 261120   ;;  %s2122_s23 = smov 96  }
  0x1f   :  { %1543 = vmatprep.mubr.msk.f32.mxu0 %vm85_vm0, %v68_v3  ;;  %1540 = vmatpush3.msra.mxu0 %v77_v1  ;;  %v69_v6 = vld [vmem:[%s2703_s0 + $0x8] sm:$0xff]  ;;  %v2229_v8 = vld [vmem:[#allocation4 + $0x60] sm:$0xff]  ;;  %v2233_v9 = vld [vmem:[#allocation4 + $0x58] sm:$0xff]  ;;  %s2123_s26 = smov 64  }
  0x20   :  { %1576 = vmatpush3.msra.mxu1 %v2215_v4  ;;  %1541 = vmatprep.subr.mxu0 %v76_v2  ;;  %v2224_v7 = vld [vmem:[#allocation4 + $0x68] sm:$0xff]  ;;  %v2239_v10 = vld [vmem:[#allocation4 + $0x50] sm:$0xff]  ;;  %v71_v12 = vld [vmem:[%s2703_s0 + $0x18] sm:$0xff] }
  0x21   :  { %1577 = vmatprep.subr.mxu1 %v2119_v0  ;;  %1542 = vmatpush3.msra.mxu0 %v76_v2  ;;  %v70_v11 = vld [vmem:[%s2703_s0 + $0x10] sm:$0xff]  ;;  %v2250_v13 = vld [vmem:[#allocation4 + $0x48] sm:$0xff]  ;;  %v2255_v14 = vld [vmem:[#allocation4 + $0x40] sm:$0xff] }
  0x22   :  { %1578 = vmatpush3.msra.mxu1 %v2217_v5  ;;  %1544 = vmatmul.mubr.msk.f32.vlgmr.msra.gmra.mxu0 %vm85_vm0, %v69_v6  ;;  %v226_v15 = vld [vmem:[%s2708_s5 + $0x18] sm:$0xff]  ;;  %v72_v16 = vld [vmem:[%s2703_s0 + $0x20] sm:$0xff]  ;;  %v73_v17 = vld [vmem:[%s2703_s0 + $0x28] sm:$0xff]  ;;  %v372_v6 = vlaneseq }
  0x23   :  { %1579 = vmatprep.subr.mxu1 %v2119_v0  ;;  %1546 = vmatprep.mubr.msk.f32.mxu0 %vm85_vm0, %v70_v11  ;;  %v225_v18 = vld [vmem:[%s2708_s5 + $0x10] sm:$0xff]  ;;  %v2271_v19 = vld [vmem:[#allocation4 + $0x38] sm:$0xff]  ;;  %v224_v22 = vld [vmem:[%s2708_s5 + $0x8] sm:$0xff] }
  0x24   :  { %1580 = vmatpush3.msra.mxu1 %v2224_v7  ;;  %1555 = vmatprep.subr.mxu0 %v226_v15  ;;  %v74_v20 = vld [vmem:[%s2703_s0 + $0x30] sm:$0xff]  ;;  %v75_v23 = vld [vmem:[%s2703_s0 + $0x38] sm:$0xff]  ;;  %v2289_v24 = vld [vmem:[#allocation4 + $0x28] sm:$0xff]  ;;  %v373_v11 = vand.u32 127, %v372_v6 }
  0x25   :  { %1581 = vmatprep.subr.mxu1 %v2119_v0  ;;  %1556 = vmatpush3.msra.mxu0 %v226_v15  ;;  %v2278_v21 = vld [vmem:[#allocation4 + $0x30] sm:$0xff]  ;;  %v223_v25 = vld [vmem:[%s2708_s5] sm:$0xff]  ;;  %v2301_v27 = vld [vmem:[#allocation4 + $0x18] sm:$0xff] }
  0x26   :  { %1582 = vmatpush3.msra.mxu1 %v2229_v8  ;;  %1547 = vmatmul.mubr.msk.f32.gmra.mxu0 %vm85_vm0, %v71_v12  ;;  %v2297_v26 = vld [vmem:[#allocation4 + $0x20] sm:$0xff]  ;;  %v2305_v28 = vld [vmem:[#allocation4 + $0x10] sm:$0xff]  ;;  %v2310_v29 = vld [vmem:[#allocation4 + $0x8] sm:$0xff]  ;;  %vm374_vm3 = vcmp.ge.s32.totalorder %v373_v11, 64  ;;  %vm375_vm4 = vcmp.lt.s32.totalorder %v373_v11, 96 }
  0x27   :  { %1583 = vmatprep.subr.mxu1 %v2119_v0  ;;  %1549 = vmatprep.mubr.msk.f32.mxu0 %vm85_vm0, %v72_v16  ;;  %v2314_v30 = vld [vmem:[#allocation4] sm:$0xff]  ;;  %vm2412_vm5 = vmand %vm374_vm3, %vm375_vm4 }
  0x28   :  { %1584 = vmatpush3.msra.mxu1 %v2233_v9  ;;  %1557 = vmatprep.subr.mxu0 %v225_v18  ;;  %v377_v31 = vld [vmem:[%s2704_s1] sm:$0xff] }
  0x29   :  { %1585 = vmatprep.subr.mxu1 %v2119_v0  ;;  %1558 = vmatpush3.msra.mxu0 %v225_v18  ;;  %v1330_v32 = vld [vmem:[%s2707_s4] ss:$0 sm:$0xff] }
  0x2a   :  { %1586 = vmatpush3.msra.mxu1 %v2239_v10  ;;  %1550 = vmatmul.mubr.msk.f32.gmra.mxu0 %vm85_vm0, %v73_v17  ;;  %v2409_v60 = vld [vmem:[%s2709_s6] ss:$0 sm:$0xff]  ;;  %s2121_s6 = smov 32  }
  0x2b   :  { %1587 = vmatprep.subr.mxu1 %v2119_v0  ;;  %1552 = vmatprep.mubr.msk.f32.mxu0 %vm85_vm0, %v74_v20  ;;  %v378_v20 = vld [vmem:[%s2705_s2] sm:$0xff] }
  0x2c   :  { %1588 = vmatpush3.msra.mxu1 %v2250_v13  ;;  %1559 = vmatprep.subr.mxu0 %v224_v22 }
  0x2d   :  { %1589 = vmatprep.subr.mxu1 %v2119_v0  ;;  %1560 = vmatpush3.msra.mxu0 %v224_v22 }
  0x2e   :  { %1590 = vmatpush3.msra.mxu1 %v2255_v14  ;;  %1553 = vmatmul.mubr.msk.f32.gmra.mxu0 %vm85_vm0, %v75_v23 }
  0x2f   :  { %1591 = vmatprep.subr.mxu1 %v2119_v0  ;;  %1561 = vmatprep.subr.mxu0 %v223_v25 }
  0x30   :  { %1592 = vmatpush3.msra.mxu1 %v2271_v19  ;;  %1562 = vmatpush3.msra.mxu0 %v223_v25 }
  0x31   :  { %1593 = vmatprep.subr.mxu1 %v2119_v0  ;;  %1645 = vmatprep.subr.mxu0 %v2119_v0 }
  0x32   :  { %1594 = vmatpush3.msra.mxu1 %v2278_v21  ;;  %1607 = vmatprep.mubr.msk.f32.mxu1 %vm2120_vm1, %v2119_v0 }
  0x33   :  { %1595 = vmatprep.subr.mxu1 %v2119_v0 }
  0x34   :  { %1596 = vmatpush3.msra.mxu1 %v2289_v24 }
  0x35   :  { %1597 = vmatprep.subr.mxu1 %v2119_v0 }
  0x36   :  { %1598 = vmatpush3.msra.mxu1 %v2297_v26 }
  0x37   :  { %1599 = vmatprep.subr.mxu1 %v2119_v0 }
  0x38   :  { %1600 = vmatpush3.msra.mxu1 %v2301_v27 }
  0x39   :  { %1601 = vmatprep.subr.mxu1 %v2119_v0 }
  0x3a   :  { %1602 = vmatpush3.msra.mxu1 %v2305_v28 }
  0x3b   :  { %1603 = vmatprep.subr.mxu1 %v2119_v0 }
  0x3c   :  { %1604 = vmatpush3.msra.mxu1 %v2310_v29 }
  0x3d   :  { %1605 = vmatprep.subr.mxu1 %v2119_v0 }
  0x3e   :  { %1606 = vmatpush3.msra.mxu1 %v2314_v30 }
  0x3f   :  { %1608 = vmatmul.mubr.f32.vlgmr.msra.gmra.mxu1 %v377_v31  ;;  %1610 = vmatprep.subr.mxu1 %v2119_v0 }
  0x40   :  { %1611 = vmatpush3.msra.mxu1 %v2215_v4  ;;  %1642 = vmatprep.mubr.msk.f32.mxu1 %vm2120_vm1, %v2119_v0 }
  0x41   :  { %1612 = vmatprep.subr.mxu1 %v2119_v0 }
  0x42   :  { %1613 = vmatpush3.msra.mxu1 %v2217_v5 }
  0x43   :  { %1614 = vmatprep.subr.mxu1 %v2119_v0 }
  0x44   :  { %1615 = vmatpush3.msra.mxu1 %v2224_v7 }
  0x45   :  { %1616 = vmatprep.subr.mxu1 %v2119_v0 }
  0x46   :  { %1617 = vmatpush3.msra.mxu1 %v2229_v8 }
  0x47   :  { %1618 = vmatprep.subr.mxu1 %v2119_v0 }
  0x48   :  { %1619 = vmatpush3.msra.mxu1 %v2233_v9 }
  0x49   :  { %1620 = vmatprep.subr.mxu1 %v2119_v0 }
  0x4a   :  { %1621 = vmatpush3.msra.mxu1 %v2239_v10 }
  0x4b   :  { %1622 = vmatprep.subr.mxu1 %v2119_v0 }
  0x4c   :  { %1623 = vmatpush3.msra.mxu1 %v2250_v13 }
  0x4d   :  { %1624 = vmatprep.subr.mxu1 %v2119_v0 }
  0x4e   :  { %1625 = vmatpush3.msra.mxu1 %v2255_v14 }
  0x4f   :  { %1626 = vmatprep.subr.mxu1 %v2119_v0 }
  0x50   :  { %1627 = vmatpush3.msra.mxu1 %v2271_v19 }
  0x51   :  { %1628 = vmatprep.subr.mxu1 %v2119_v0 }
  0x52   :  { %1629 = vmatpush3.msra.mxu1 %v2278_v21 }
  0x53   :  { %1630 = vmatprep.subr.mxu1 %v2119_v0 }
  0x54   :  { %1631 = vmatpush3.msra.mxu1 %v2289_v24 }
  0x55   :  { %1632 = vmatprep.subr.mxu1 %v2119_v0 }
  0x56   :  { %1633 = vmatpush3.msra.mxu1 %v2297_v26 }
  0x57   :  { %1634 = vmatprep.subr.mxu1 %v2119_v0 }
  0x58   :  { %1635 = vmatpush3.msra.mxu1 %v2301_v27 }
  0x59   :  { %1636 = vmatprep.subr.mxu1 %v2119_v0 }
  0x5a   :  { %1637 = vmatpush3.msra.mxu1 %v2305_v28 }
  0x5b   :  { %1638 = vmatprep.subr.mxu1 %v2119_v0 }
  0x5c   :  { %1639 = vmatpush3.msra.mxu1 %v2310_v29 }
  0x5d   :  { %1640 = vmatprep.subr.mxu1 %v2119_v0 }
  0x5e   :  { %1641 = vmatpush3.msra.mxu1 %v2314_v30 }
  0x5f   :  { %1680 = vmatprep.subr.mxu1 %v2119_v0 }
  0xe2   :  { %v1545_v33 = vpop.f32.mrf.mxu0 }
  0xe3   :  { %v182_v34 = vadd.f32 %v1545_v33, %v1330_v32 }
  0xe4   :  { %v176_v35 = vpop.f32.mrf.mxu0 }
  0xe5   :  { %v177_v36 = vadd.f32 %v1330_v32, %v176_v35 }
  0xe6   :  { %v1548_v39 = vpop.f32.mrf.mxu0 }
  0xe7   :  { %1911 = vtanh.f32 %v177_v36  ;;  %v192_v40 = vadd.f32 %v1548_v39, %v1330_v32 }
  0xe8   :  { %1913 = vtanh.f32 %v182_v34  ;;  %v186_v41 = vpop.f32.mrf.mxu0 }
  0xe9   :  { %v187_v42 = vadd.f32 %v1330_v32, %v186_v41  ;;  %1915 = vtanh.f32 %v192_v40 }
  0xea   :  { %v1551_v43 = vpop.f32.mrf.mxu0 }
  0xeb   :  { %1917 = vtanh.f32 %v187_v42  ;;  %v202_v44 = vadd.f32 %v1551_v43, %v1330_v32 }
  0xec   :  { %v196_v45 = vpop.f32.mrf.mxu0 }
  0xed   :  { %v197_v46 = vadd.f32 %v1330_v32, %v196_v45  ;;  %1919 = vtanh.f32 %v202_v44 }
  0xee   :  { %v1554_v47 = vpop.f32.mrf.mxu0 }
  0xef   :  { %1921 = vtanh.f32 %v197_v46  ;;  %v212_v48 = vadd.f32 %v1554_v47, %v1330_v32 }
  0xf0   :  { %v206_v49 = vpop.f32.mrf.mxu0 }
  0xf1   :  { %v207_v50 = vadd.f32 %v1330_v32, %v206_v49  ;;  %1923 = vtanh.f32 %v212_v48 }
  0xf3   :  { %1925 = vtanh.f32 %v207_v50 }
  0xf4   :  { %v1912_v37 = vpop.eup %1911 }
  0xf5   :  { %v1914_v38 = vpop.eup %1913  ;;  %1563 = vmatprep.mubr.msk.f32.mxu0 %vm234_vm2, %v1912_v37 }
  0xf6   :  { %1564 = vmatmul.mubr.msk.f32.vlgmr.msra.gmra.mxu0 %vm234_vm2, %v1914_v38  ;;  %v1916_v51 = vpop.eup %1915 }
  0xf7   :  { %1646 = vmatpush3.msra.mxu0 %v2215_v4 }
  0xf8   :  { %1647 = vmatprep.subr.mxu0 %v2119_v0  ;;  %v1918_v52 = vpop.eup %1917 }
  0xf9   :  { %1648 = vmatpush3.msra.mxu0 %v2217_v5  ;;  %1566 = vmatprep.mubr.msk.f32.mxu0 %vm234_vm2, %v1918_v52 }
  0xfa   :  { %1649 = vmatprep.subr.mxu0 %v2119_v0  ;;  %1567 = vmatmul.mubr.msk.f32.gmra.mxu0 %vm234_vm2, %v1916_v51  ;;  %v1920_v54 = vpop.eup %1919 }
  0xfb   :  { %1650 = vmatpush3.msra.mxu0 %v2224_v7 }
  0xfc   :  { %1651 = vmatprep.subr.mxu0 %v2119_v0  ;;  %v1922_v55 = vpop.eup %1921 }
  0xfd   :  { %1652 = vmatpush3.msra.mxu0 %v2229_v8  ;;  %1569 = vmatprep.mubr.msk.f32.mxu0 %vm234_vm2, %v1922_v55 }
  0xfe   :  { %1653 = vmatprep.subr.mxu0 %v2119_v0  ;;  %1570 = vmatmul.mubr.msk.f32.gmra.mxu0 %vm234_vm2, %v1920_v54  ;;  %v1924_v57 = vpop.eup %1923 }
  0xff   :  { %1654 = vmatpush3.msra.mxu0 %v2233_v9  ;;  %v462_v53 = vpop.f32.mrf.mxu1 }
 0x100   :  { %1655 = vmatprep.subr.mxu0 %v2119_v0  ;;  %v1926_v58 = vpop.eup %1925 }
 0x101   :  { %1656 = vmatpush3.msra.mxu0 %v2239_v10  ;;  %v1609_v56 = vpop.f32.mrf.mxu1  ;;  %1572 = vmatprep.mubr.msk.f32.mxu0 %vm234_vm2, %v1926_v58 }
 0x102   :  { %1657 = vmatprep.subr.mxu0 %v2119_v0  ;;  %1573 = vmatmul.mubr.msk.f32.gmra.mxu0 %vm234_vm2, %v1924_v57 }
 0x103   :  { %1658 = vmatpush3.msra.mxu0 %v2250_v13  ;;  %1677 = vmatprep.mubr.msk.f32.mxu0 %vm2120_vm1, %v2119_v0 }
 0x104   :  { %1659 = vmatprep.subr.mxu0 %v2119_v0 }
 0x105   :  { %1660 = vmatpush3.msra.mxu0 %v2255_v14 }
 0x106   :  { %1661 = vmatprep.subr.mxu0 %v2119_v0 }
 0x107   :  { %1662 = vmatpush3.msra.mxu0 %v2271_v19 }
 0x108   :  { %1663 = vmatprep.subr.mxu0 %v2119_v0 }
 0x109   :  { %1664 = vmatpush3.msra.mxu0 %v2278_v21 }
 0x10a   :  { %1665 = vmatprep.subr.mxu0 %v2119_v0 }
 0x10b   :  { %1666 = vmatpush3.msra.mxu0 %v2289_v24 }
 0x10c   :  { %1667 = vmatprep.subr.mxu0 %v2119_v0 }
 0x10d   :  { %1668 = vmatpush3.msra.mxu0 %v2297_v26 }
 0x10e   :  { %1669 = vmatprep.subr.mxu0 %v2119_v0 }
 0x10f   :  { %1670 = vmatpush3.msra.mxu0 %v2301_v27 }
 0x110   :  { %1671 = vmatprep.subr.mxu0 %v2119_v0 }
 0x111   :  { %1672 = vmatpush3.msra.mxu0 %v2305_v28 }
 0x112   :  { %1673 = vmatprep.subr.mxu0 %v2119_v0 }
 0x113   :  { %1674 = vmatpush3.msra.mxu0 %v2310_v29 }
 0x114   :  { %1675 = vmatprep.subr.mxu0 %v2119_v0 }
 0x115   :  { %1676 = vmatpush3.msra.mxu0 %v2314_v30 }
 0x116   :  { %1715 = vmatprep.subr.mxu0 %v2119_v0 }
 0x1b6   :  { %v2404_v59 = vpop.f32.mrf.mxu0 }
 0x1b7   :  { %v331_v35 = vadd.f32 %v2404_v59, %v2409_v60 }
 0x1b8   :  { %v325_v61 = vpop.f32.mrf.mxu0 }
 0x1b9   :  { %v326_v62 = vadd.f32 %v2409_v60, %v325_v61 }
 0x1bb   :  { %v466_v63 = vadd.f32 %v462_v53, %v326_v62  ;;  %v2508_v53 = vpop.f32.mrf.mxu0 }
 0x1bd   :  { %v1348_v1 = vmul.f32 -1.442695, %v466_v63  ;;  %v335_v54 = vpop.f32.mrf.mxu0 }
 0x1be   :  { %v336_v59 = vadd.f32 %v2409_v60, %v335_v54 }
 0x1bf   :  { %1927 = vpow2.f32 %v1348_v1  ;;  %v2510_v55 = vpop.f32.mrf.mxu0 }
 0x1c0   :  { %1929 = vtanh.f32 %v466_v63 }
 0x1c1   :  { %v2512_v56 = vpop.f32.mrf.mxu0 }
 0x1c3   :  { %v2514_v57 = vpop.f32.mrf.mxu0 }
 0x1c5   :  { %v2516_v58 = vpop.f32.mrf.mxu0 }
 0x1cc   :  { %v1928_v2 = vpop.eup %1927 }
 0x1cd   :  { %v470_v3 = vadd.f32 1.0, %v1928_v2  ;;  %v1930_v15 = vpop.eup %1929 }
 0x1cf   :  { %1931 = vrcp.f32 %v470_v3 }
 0x1dc   :  { %v1932_v16 = vpop.eup %1931 }
 0x1dd   :  { %v474_v17 = vsel %vm2412_vm5, %v1930_v15, %v1932_v16 }
 0x1de   :  { %479 = vrot.lane.b32.xlu1 %v474_v17, %s2121_s6  ;;  %475 = vrot.lane.b32.xlu0 %v474_v17, %s2122_s23 }
 0x1e2   :  { %477 = vrot.lane.b32.xlu0 %v474_v17, %s2123_s26 }
 0x250   :  { %v476_v18 = vpop.permute.xlu0 %475  ;;  %v480_v33 = vpop.permute.xlu1 %479 }
 0x251   :  { %v481_v23 = vmul.f32 %v476_v18, %v378_v20 }
 0x254   :  { %v478_v22 = vpop.permute.xlu0 %477 }
 0x255   :  { %v482_v25 = vmul.f32 %v478_v22, %v474_v17 }
 0x257   :  { %v483_v31 = vadd.f32 %v482_v25, %v481_v23 }
 0x259   :  { %1933 = vtanh.f32 %v483_v31 }
 0x266   :  { %v1934_v32 = vpop.eup %1933 }
 0x267   :  { %v2424_v34 = vmul.f32 %v1934_v32, %v480_v33  ;;  %v341_v32 = vadd.f32 %v2508_v53, %v2409_v60 }
 0x269   :  { %1643 = vmatmul.mubr.f32.vlgmr.msra.gmra.mxu1 %v2424_v34 }
 0x26a   :  { %1681 = vmatpush3.msra.mxu1 %v2215_v4  ;;  %1712 = vmatprep.mubr.msk.f32.mxu1 %vm2120_vm1, %v2119_v0 }
 0x26b   :  { %1682 = vmatprep.subr.mxu1 %v2119_v0 }
 0x26c   :  { %1683 = vmatpush3.msra.mxu1 %v2217_v5 }
 0x26d   :  { %1684 = vmatprep.subr.mxu1 %v2119_v0 }
 0x26e   :  { %1685 = vmatpush3.msra.mxu1 %v2224_v7 }
 0x26f   :  { %1686 = vmatprep.subr.mxu1 %v2119_v0 }
 0x270   :  { %1687 = vmatpush3.msra.mxu1 %v2229_v8 }
 0x271   :  { %1688 = vmatprep.subr.mxu1 %v2119_v0 }
 0x272   :  { %1689 = vmatpush3.msra.mxu1 %v2233_v9 }
 0x273   :  { %1690 = vmatprep.subr.mxu1 %v2119_v0 }
 0x274   :  { %1691 = vmatpush3.msra.mxu1 %v2239_v10 }
 0x275   :  { %1692 = vmatprep.subr.mxu1 %v2119_v0 }
 0x276   :  { %1693 = vmatpush3.msra.mxu1 %v2250_v13 }
 0x277   :  { %1694 = vmatprep.subr.mxu1 %v2119_v0 }
 0x278   :  { %1695 = vmatpush3.msra.mxu1 %v2255_v14 }
 0x279   :  { %1696 = vmatprep.subr.mxu1 %v2119_v0 }
 0x27a   :  { %1697 = vmatpush3.msra.mxu1 %v2271_v19 }
 0x27b   :  { %1698 = vmatprep.subr.mxu1 %v2119_v0 }
 0x27c   :  { %1699 = vmatpush3.msra.mxu1 %v2278_v21 }
 0x27d   :  { %1700 = vmatprep.subr.mxu1 %v2119_v0 }
 0x27e   :  { %1701 = vmatpush3.msra.mxu1 %v2289_v24 }
 0x27f   :  { %1702 = vmatprep.subr.mxu1 %v2119_v0 }
 0x280   :  { %1703 = vmatpush3.msra.mxu1 %v2297_v26 }
 0x281   :  { %1704 = vmatprep.subr.mxu1 %v2119_v0 }
 0x282   :  { %1705 = vmatpush3.msra.mxu1 %v2301_v27 }
 0x283   :  { %1706 = vmatprep.subr.mxu1 %v2119_v0 }
 0x284   :  { %1707 = vmatpush3.msra.mxu1 %v2305_v28 }
 0x285   :  { %1708 = vmatprep.subr.mxu1 %v2119_v0 }
 0x286   :  { %1709 = vmatpush3.msra.mxu1 %v2310_v29 }
 0x287   :  { %1710 = vmatprep.subr.mxu1 %v2119_v0 }
 0x288   :  { %1711 = vmatpush3.msra.mxu1 %v2314_v30 }
 0x289   :  { %1750 = vmatprep.subr.mxu1 %v2119_v0 }
 0x329   :  { %v554_v36 = vpop.f32.mrf.mxu1 }
 0x32a   :  { %v558_v37 = vadd.f32 %v554_v36, %v331_v35 }
 0x32b   :  { %v1644_v38 = vpop.f32.mrf.mxu1 }
 0x32c   :  { %v1349_v39 = vmul.f32 -1.442695, %v558_v37 }
 0x32e   :  { %1935 = vpow2.f32 %v1349_v39 }
 0x32f   :  { %1937 = vtanh.f32 %v558_v37 }
 0x33b   :  { %v1936_v40 = vpop.eup %1935 }
 0x33c   :  { %v562_v41 = vadd.f32 1.0, %v1936_v40  ;;  %v1938_v42 = vpop.eup %1937 }
 0x33e   :  { %1939 = vrcp.f32 %v562_v41 }
 0x34b   :  { %v1940_v43 = vpop.eup %1939 }
 0x34c   :  { %v566_v44 = vsel %vm2412_vm5, %v1938_v42, %v1940_v43 }
 0x34d   :  { %569 = vrot.lane.b32.xlu0 %v566_v44, %s2123_s26  ;;  %567 = vrot.lane.b32.xlu1 %v566_v44, %s2122_s23 }
 0x351   :  { %571 = vrot.lane.b32.xlu1 %v566_v44, %s2121_s6 }
 0x3bf   :  { %v570_v45 = vpop.permute.xlu0 %569  ;;  %v568_v46 = vpop.permute.xlu1 %567 }
 0x3c0   :  { %v574_v47 = vmul.f32 %v570_v45, %v566_v44  ;;  %v573_v48 = vmul.f32 %v568_v46, %v483_v31 }
 0x3c2   :  { %v2468_v49 = vadd.f32 %v574_v47, %v573_v48 }
 0x3c3   :  { %v572_v51 = vpop.permute.xlu1 %571 }
 0x3c4   :  { %1941 = vtanh.f32 %v2468_v49 }
 0x3d1   :  { %v1942_v50 = vpop.eup %1941 }
 0x3d2   :  { %v2471_v52 = vmul.f32 %v1942_v50, %v572_v51  ;;  %v346_v51 = vadd.f32 %v2409_v60, %v2512_v56 }
 0x3d4   :  { %1678 = vmatmul.mubr.f32.vlgmr.msra.gmra.mxu0 %v2471_v52 }
 0x3d5   :  { %1716 = vmatpush3.msra.mxu0 %v2215_v4  ;;  %1747 = vmatprep.mubr.msk.f32.mxu0 %vm2120_vm1, %v2119_v0 }
 0x3d6   :  { %1717 = vmatprep.subr.mxu0 %v2119_v0 }
 0x3d7   :  { %1718 = vmatpush3.msra.mxu0 %v2217_v5 }
 0x3d8   :  { %1719 = vmatprep.subr.mxu0 %v2119_v0 }
 0x3d9   :  { %1720 = vmatpush3.msra.mxu0 %v2224_v7 }
 0x3da   :  { %1721 = vmatprep.subr.mxu0 %v2119_v0 }
 0x3db   :  { %1722 = vmatpush3.msra.mxu0 %v2229_v8 }
 0x3dc   :  { %1723 = vmatprep.subr.mxu0 %v2119_v0 }
 0x3dd   :  { %1724 = vmatpush3.msra.mxu0 %v2233_v9 }
 0x3de   :  { %1725 = vmatprep.subr.mxu0 %v2119_v0 }
 0x3df   :  { %1726 = vmatpush3.msra.mxu0 %v2239_v10 }
 0x3e0   :  { %1727 = vmatprep.subr.mxu0 %v2119_v0 }
 0x3e1   :  { %1728 = vmatpush3.msra.mxu0 %v2250_v13 }
 0x3e2   :  { %1729 = vmatprep.subr.mxu0 %v2119_v0 }
 0x3e3   :  { %1730 = vmatpush3.msra.mxu0 %v2255_v14 }
 0x3e4   :  { %1731 = vmatprep.subr.mxu0 %v2119_v0 }
 0x3e5   :  { %1732 = vmatpush3.msra.mxu0 %v2271_v19 }
 0x3e6   :  { %1733 = vmatprep.subr.mxu0 %v2119_v0 }
 0x3e7   :  { %1734 = vmatpush3.msra.mxu0 %v2278_v21 }
 0x3e8   :  { %1735 = vmatprep.subr.mxu0 %v2119_v0 }
 0x3e9   :  { %1736 = vmatpush3.msra.mxu0 %v2289_v24 }
 0x3ea   :  { %1737 = vmatprep.subr.mxu0 %v2119_v0 }
 0x3eb   :  { %1738 = vmatpush3.msra.mxu0 %v2297_v26 }
 0x3ec   :  { %1739 = vmatprep.subr.mxu0 %v2119_v0 }
 0x3ed   :  { %1740 = vmatpush3.msra.mxu0 %v2301_v27 }
 0x3ee   :  { %1741 = vmatprep.subr.mxu0 %v2119_v0 }
 0x3ef   :  { %1742 = vmatpush3.msra.mxu0 %v2305_v28 }
 0x3f0   :  { %1743 = vmatprep.subr.mxu0 %v2119_v0 }
 0x3f1   :  { %1744 = vmatpush3.msra.mxu0 %v2310_v29 }
 0x3f2   :  { %1745 = vmatprep.subr.mxu0 %v2119_v0 }
 0x3f3   :  { %1746 = vmatpush3.msra.mxu0 %v2314_v30 }
 0x3f4   :  { %1785 = vmatprep.subr.mxu0 %v2119_v0 }
 0x494   :  { %v646_v61 = vpop.f32.mrf.mxu0 }
 0x495   :  { %v650_v62 = vadd.f32 %v646_v61, %v336_v59 }
 0x496   :  { %v1679_v63 = vpop.f32.mrf.mxu0 }
 0x497   :  { %v1350_v1 = vmul.f32 -1.442695, %v650_v62 }
 0x499   :  { %1943 = vpow2.f32 %v1350_v1 }
 0x49a   :  { %1945 = vtanh.f32 %v650_v62 }
 0x4a6   :  { %v1944_v2 = vpop.eup %1943 }
 0x4a7   :  { %v654_v3 = vadd.f32 1.0, %v1944_v2  ;;  %v1946_v6 = vpop.eup %1945 }
 0x4a9   :  { %1947 = vrcp.f32 %v654_v3 }
 0x4b6   :  { %v1948_v11 = vpop.eup %1947 }
 0x4b7   :  { %v658_v15 = vsel %vm2412_vm5, %v1946_v6, %v1948_v11 }
 0x4b8   :  { %661 = vrot.lane.b32.xlu1 %v658_v15, %s2123_s26  ;;  %659 = vrot.lane.b32.xlu0 %v658_v15, %s2122_s23 }
 0x4bc   :  { %663 = vrot.lane.b32.xlu0 %v658_v15, %s2121_s6 }
 0x52a   :  { %v662_v16 = vpop.permute.xlu1 %661  ;;  %v660_v17 = vpop.permute.xlu0 %659 }
 0x52b   :  { %v666_v18 = vmul.f32 %v662_v16, %v658_v15  ;;  %v665_v20 = vmul.f32 %v660_v17, %v2468_v49 }
 0x52d   :  { %v667_v22 = vadd.f32 %v666_v18, %v665_v20 }
 0x52e   :  { %v664_v25 = vpop.permute.xlu0 %663 }
 0x52f   :  { %1949 = vtanh.f32 %v667_v22 }
 0x53c   :  { %v1950_v23 = vpop.eup %1949 }
 0x53d   :  { %v2525_v31 = vmul.f32 %v1950_v23, %v664_v25  ;;  %v1155_v23 = vld [vmem:[#allocation7 + $0x70] sm:$0xff]  ;;  %v1154_v25 = vld [vmem:[#allocation7 + $0x68] sm:$0xff] }
 0x53f   :  { %1713 = vmatmul.mubr.f32.vlgmr.msra.gmra.mxu1 %v2525_v31 }
 0x540   :  { %1751 = vmatpush3.msra.mxu1 %v2215_v4  ;;  %1782 = vmatprep.mubr.msk.f32.mxu1 %vm2120_vm1, %v2119_v0 }
 0x541   :  { %1752 = vmatprep.subr.mxu1 %v2119_v0 }
 0x542   :  { %1753 = vmatpush3.msra.mxu1 %v2217_v5 }
 0x543   :  { %1754 = vmatprep.subr.mxu1 %v2119_v0 }
 0x544   :  { %1755 = vmatpush3.msra.mxu1 %v2224_v7 }
 0x545   :  { %1756 = vmatprep.subr.mxu1 %v2119_v0 }
 0x546   :  { %1757 = vmatpush3.msra.mxu1 %v2229_v8 }
 0x547   :  { %1758 = vmatprep.subr.mxu1 %v2119_v0 }
 0x548   :  { %1759 = vmatpush3.msra.mxu1 %v2233_v9 }
 0x549   :  { %1760 = vmatprep.subr.mxu1 %v2119_v0 }
 0x54a   :  { %1761 = vmatpush3.msra.mxu1 %v2239_v10 }
 0x54b   :  { %1762 = vmatprep.subr.mxu1 %v2119_v0 }
 0x54c   :  { %1763 = vmatpush3.msra.mxu1 %v2250_v13 }
 0x54d   :  { %1764 = vmatprep.subr.mxu1 %v2119_v0 }
 0x54e   :  { %1765 = vmatpush3.msra.mxu1 %v2255_v14 }
 0x54f   :  { %1766 = vmatprep.subr.mxu1 %v2119_v0 }
 0x550   :  { %1767 = vmatpush3.msra.mxu1 %v2271_v19 }
 0x551   :  { %1768 = vmatprep.subr.mxu1 %v2119_v0 }
 0x552   :  { %1769 = vmatpush3.msra.mxu1 %v2278_v21 }
 0x553   :  { %1770 = vmatprep.subr.mxu1 %v2119_v0 }
 0x554   :  { %1771 = vmatpush3.msra.mxu1 %v2289_v24 }
 0x555   :  { %1772 = vmatprep.subr.mxu1 %v2119_v0 }
 0x556   :  { %1773 = vmatpush3.msra.mxu1 %v2297_v26 }
 0x557   :  { %1774 = vmatprep.subr.mxu1 %v2119_v0 }
 0x558   :  { %1775 = vmatpush3.msra.mxu1 %v2301_v27 }
 0x559   :  { %1776 = vmatprep.subr.mxu1 %v2119_v0 }
 0x55a   :  { %1777 = vmatpush3.msra.mxu1 %v2305_v28 }
 0x55b   :  { %1778 = vmatprep.subr.mxu1 %v2119_v0 }
 0x55c   :  { %1779 = vmatpush3.msra.mxu1 %v2310_v29 }
 0x55d   :  { %1780 = vmatprep.subr.mxu1 %v2119_v0 }
 0x55e   :  { %1781 = vmatpush3.msra.mxu1 %v2314_v30 }
 0x55f   :  { %1820 = vmatprep.subr.mxu1 %v2119_v0 }
 0x5ff   :  { %v738_v33 = vpop.f32.mrf.mxu1 }
 0x600   :  { %v742_v35 = vadd.f32 %v738_v33, %v341_v32  ;;  %v1153_v32 = vld [vmem:[#allocation7 + $0x60] sm:$0xff]  ;;  %v1152_v33 = vld [vmem:[#allocation7 + $0x58] sm:$0xff] }
 0x601   :  { %v1714_v36 = vpop.f32.mrf.mxu1 }
 0x602   :  { %v1351_v37 = vmul.f32 -1.442695, %v742_v35  ;;  %v1150_v36 = vld [vmem:[#allocation7 + $0x48] sm:$0xff] }
 0x604   :  { %1951 = vpow2.f32 %v1351_v37  ;;  %v1149_v37 = vld [vmem:[#allocation7 + $0x40] sm:$0xff] }
 0x605   :  { %1953 = vtanh.f32 %v742_v35  ;;  %v1151_v35 = vld [vmem:[#allocation7 + $0x50] sm:$0xff] }
 0x611   :  { %v1952_v38 = vpop.eup %1951 }
 0x612   :  { %v746_v39 = vadd.f32 1.0, %v1952_v38  ;;  %v1954_v40 = vpop.eup %1953  ;;  %v1148_v38 = vld [vmem:[#allocation7 + $0x38] sm:$0xff] }
 0x614   :  { %1955 = vrcp.f32 %v746_v39  ;;  %v1146_v39 = vld [vmem:[#allocation7 + $0x28] sm:$0xff] }
 0x621   :  { %v1956_v41 = vpop.eup %1955 }
 0x622   :  { %v750_v42 = vsel %vm2412_vm5, %v1954_v40, %v1956_v41  ;;  %v1145_v40 = vld [vmem:[#allocation7 + $0x20] sm:$0xff]  ;;  %v1144_v41 = vld [vmem:[#allocation7 + $0x18] sm:$0xff] }
 0x623   :  { %753 = vrot.lane.b32.xlu0 %v750_v42, %s2123_s26  ;;  %751 = vrot.lane.b32.xlu1 %v750_v42, %s2122_s23 }
 0x627   :  { %755 = vrot.lane.b32.xlu1 %v750_v42, %s2121_s6 }
 0x695   :  { %v754_v43 = vpop.permute.xlu0 %753  ;;  %v752_v44 = vpop.permute.xlu1 %751 }
 0x696   :  { %v758_v45 = vmul.f32 %v754_v43, %v750_v42  ;;  %v757_v46 = vmul.f32 %v752_v44, %v667_v22  ;;  %v1143_v42 = vld [vmem:[#allocation7 + $0x10] sm:$0xff]  ;;  %v1142_v43 = vld [vmem:[#allocation7 + $0x8] sm:$0xff]  ;;  %v1141_v44 = vld [vmem:[#allocation7] sm:$0xff] }
 0x698   :  { %v759_v47 = vadd.f32 %v758_v45, %v757_v46  ;;  %v356_v45 = vadd.f32 %v2409_v60, %v2516_v58 }
 0x699   :  { %v756_v49 = vpop.permute.xlu1 %755 }
 0x69a   :  { %1957 = vtanh.f32 %v759_v47 }
 0x6a7   :  { %v1958_v48 = vpop.eup %1957 }
 0x6a8   :  { %v2569_v50 = vmul.f32 %v1958_v48, %v756_v49 }
 0x6aa   :  { %1748 = vmatmul.mubr.f32.vlgmr.msra.gmra.mxu0 %v2569_v50 }
 0x6ab   :  { %1786 = vmatpush3.msra.mxu0 %v2215_v4  ;;  %1817 = vmatprep.mubr.msk.f32.mxu0 %vm2120_vm1, %v2119_v0 }
 0x6ac   :  { %1787 = vmatprep.subr.mxu0 %v2119_v0 }
 0x6ad   :  { %1788 = vmatpush3.msra.mxu0 %v2217_v5 }
 0x6ae   :  { %1789 = vmatprep.subr.mxu0 %v2119_v0 }
 0x6af   :  { %1790 = vmatpush3.msra.mxu0 %v2224_v7 }
 0x6b0   :  { %1791 = vmatprep.subr.mxu0 %v2119_v0 }
 0x6b1   :  { %1792 = vmatpush3.msra.mxu0 %v2229_v8 }
 0x6b2   :  { %1793 = vmatprep.subr.mxu0 %v2119_v0 }
 0x6b3   :  { %1794 = vmatpush3.msra.mxu0 %v2233_v9 }
 0x6b4   :  { %1795 = vmatprep.subr.mxu0 %v2119_v0 }
 0x6b5   :  { %1796 = vmatpush3.msra.mxu0 %v2239_v10 }
 0x6b6   :  { %1797 = vmatprep.subr.mxu0 %v2119_v0 }
 0x6b7   :  { %1798 = vmatpush3.msra.mxu0 %v2250_v13 }
 0x6b8   :  { %1799 = vmatprep.subr.mxu0 %v2119_v0 }
 0x6b9   :  { %1800 = vmatpush3.msra.mxu0 %v2255_v14 }
 0x6ba   :  { %1801 = vmatprep.subr.mxu0 %v2119_v0 }
 0x6bb   :  { %1802 = vmatpush3.msra.mxu0 %v2271_v19 }
 0x6bc   :  { %1803 = vmatprep.subr.mxu0 %v2119_v0 }
 0x6bd   :  { %1804 = vmatpush3.msra.mxu0 %v2278_v21 }
 0x6be   :  { %1805 = vmatprep.subr.mxu0 %v2119_v0 }
 0x6bf   :  { %1806 = vmatpush3.msra.mxu0 %v2289_v24 }
 0x6c0   :  { %1807 = vmatprep.subr.mxu0 %v2119_v0 }
 0x6c1   :  { %1808 = vmatpush3.msra.mxu0 %v2297_v26 }
 0x6c2   :  { %1809 = vmatprep.subr.mxu0 %v2119_v0 }
 0x6c3   :  { %1810 = vmatpush3.msra.mxu0 %v2301_v27 }
 0x6c4   :  { %1811 = vmatprep.subr.mxu0 %v2119_v0 }
 0x6c5   :  { %1812 = vmatpush3.msra.mxu0 %v2305_v28 }
 0x6c6   :  { %1813 = vmatprep.subr.mxu0 %v2119_v0 }
 0x6c7   :  { %1814 = vmatpush3.msra.mxu0 %v2310_v29 }
 0x6c8   :  { %1815 = vmatprep.subr.mxu0 %v2119_v0 }
 0x6c9   :  { %1816 = vmatpush3.msra.mxu0 %v2314_v30 }
 0x76a   :  { %v830_v53 = vpop.f32.mrf.mxu0 }
 0x76b   :  { %v834_v54 = vadd.f32 %v830_v53, %v346_v51 }
 0x76c   :  { %v1749_v59 = vpop.f32.mrf.mxu0 }
 0x76d   :  { %v1352_v61 = vmul.f32 -1.442695, %v834_v54 }
 0x76f   :  { %1959 = vpow2.f32 %v1352_v61 }
 0x770   :  { %1961 = vtanh.f32 %v834_v54 }
 0x77c   :  { %v1960_v62 = vpop.eup %1959 }
 0x77d   :  { %v838_v63 = vadd.f32 1.0, %v1960_v62  ;;  %v1962_v1 = vpop.eup %1961 }
 0x77f   :  { %1963 = vrcp.f32 %v838_v63 }
 0x78c   :  { %v1964_v2 = vpop.eup %1963 }
 0x78d   :  { %v842_v3 = vsel %vm2412_vm5, %v1962_v1, %v1964_v2 }
 0x78e   :  { %845 = vrot.lane.b32.xlu1 %v842_v3, %s2123_s26  ;;  %843 = vrot.lane.b32.xlu0 %v842_v3, %s2122_s23 }
 0x792   :  { %847 = vrot.lane.b32.xlu0 %v842_v3, %s2121_s6 }
 0x800   :  { %v846_v56 = vpop.permute.xlu1 %845  ;;  %v844_v6 = vpop.permute.xlu0 %843 }
 0x801   :  { %v850_v11 = vmul.f32 %v846_v56, %v842_v3  ;;  %v849_v15 = vmul.f32 %v844_v6, %v759_v47 }
 0x803   :  { %v851_v16 = vadd.f32 %v850_v11, %v849_v15 }
 0x804   :  { %v848_v18 = vpop.permute.xlu0 %847 }
 0x805   :  { %1965 = vtanh.f32 %v851_v16 }
 0x812   :  { %v1966_v17 = vpop.eup %1965 }
 0x813   :  { %v2612_v20 = vmul.f32 %v1966_v17, %v848_v18 }
 0x815   :  { %1783 = vmatmul.mubr.f32.vlgmr.msra.gmra.mxu1 %v2612_v20 }
 0x816   :  { %1821 = vmatpush3.msra.mxu1 %v2215_v4  ;;  %1852 = vmatprep.mubr.msk.f32.mxu1 %vm2120_vm1, %v2119_v0  ;;  %v351_v4 = vadd.f32 %v2510_v55, %v2409_v60 }
 0x817   :  { %1822 = vmatprep.subr.mxu1 %v2119_v0 }
 0x818   :  { %1823 = vmatpush3.msra.mxu1 %v2217_v5 }
 0x819   :  { %1824 = vmatprep.subr.mxu1 %v2119_v0 }
 0x81a   :  { %1825 = vmatpush3.msra.mxu1 %v2224_v7 }
 0x81b   :  { %1826 = vmatprep.subr.mxu1 %v2119_v0 }
 0x81c   :  { %1827 = vmatpush3.msra.mxu1 %v2229_v8 }
 0x81d   :  { %1828 = vmatprep.subr.mxu1 %v2119_v0 }
 0x81e   :  { %1829 = vmatpush3.msra.mxu1 %v2233_v9 }
 0x81f   :  { %1830 = vmatprep.subr.mxu1 %v2119_v0 }
 0x820   :  { %1831 = vmatpush3.msra.mxu1 %v2239_v10 }
 0x821   :  { %1832 = vmatprep.subr.mxu1 %v2119_v0 }
 0x822   :  { %1833 = vmatpush3.msra.mxu1 %v2250_v13 }
 0x823   :  { %1834 = vmatprep.subr.mxu1 %v2119_v0 }
 0x824   :  { %1835 = vmatpush3.msra.mxu1 %v2255_v14 }
 0x825   :  { %1836 = vmatprep.subr.mxu1 %v2119_v0 }
 0x826   :  { %1837 = vmatpush3.msra.mxu1 %v2271_v19 }
 0x827   :  { %1838 = vmatprep.subr.mxu1 %v2119_v0 }
 0x828   :  { %1839 = vmatpush3.msra.mxu1 %v2278_v21 }
 0x829   :  { %1840 = vmatprep.subr.mxu1 %v2119_v0 }
 0x82a   :  { %1841 = vmatpush3.msra.mxu1 %v2289_v24 }
 0x82b   :  { %1842 = vmatprep.subr.mxu1 %v2119_v0 }
 0x82c   :  { %1843 = vmatpush3.msra.mxu1 %v2297_v26 }
 0x82d   :  { %1844 = vmatprep.subr.mxu1 %v2119_v0 }
 0x82e   :  { %1845 = vmatpush3.msra.mxu1 %v2301_v27 }
 0x82f   :  { %1846 = vmatprep.subr.mxu1 %v2119_v0 }
 0x830   :  { %1847 = vmatpush3.msra.mxu1 %v2305_v28 }
 0x831   :  { %1848 = vmatprep.subr.mxu1 %v2119_v0 }
 0x832   :  { %1849 = vmatpush3.msra.mxu1 %v2310_v29 }
 0x833   :  { %1850 = vmatprep.subr.mxu1 %v2119_v0  ;;  %v1156_v0 = vld [vmem:[#allocation7 + $0x78] sm:$0xff] }
 0x834   :  { %1851 = vmatpush3.msra.mxu1 %v2314_v30  ;;  %1855 = vmatprep.subr.mxu0 %v1156_v0 }
 0x8d5   :  { %v922_v5 = vpop.f32.mrf.mxu1 }
 0x8d6   :  { %v926_v7 = vadd.f32 %v922_v5, %v351_v4 }
 0x8d7   :  { %v1784_v8 = vpop.f32.mrf.mxu1 }
 0x8d8   :  { %v1353_v9 = vmul.f32 -1.442695, %v926_v7 }
 0x8da   :  { %1967 = vpow2.f32 %v1353_v9 }
 0x8db   :  { %1969 = vtanh.f32 %v926_v7 }
 0x8e7   :  { %v1968_v10 = vpop.eup %1967 }
 0x8e8   :  { %v930_v13 = vadd.f32 1.0, %v1968_v10  ;;  %v1970_v14 = vpop.eup %1969 }
 0x8ea   :  { %1971 = vrcp.f32 %v930_v13 }
 0x8f7   :  { %v1972_v19 = vpop.eup %1971 }
 0x8f8   :  { %v934_v21 = vsel %vm2412_vm5, %v1970_v14, %v1972_v19 }
 0x8f9   :  { %937 = vrot.lane.b32.xlu0 %v934_v21, %s2123_s26  ;;  %935 = vrot.lane.b32.xlu1 %v934_v21, %s2122_s23 }
 0x8fd   :  { %939 = vrot.lane.b32.xlu1 %v934_v21, %s2121_s6 }
 0x96b   :  { %v938_v24 = vpop.permute.xlu0 %937  ;;  %v936_v26 = vpop.permute.xlu1 %935 }
 0x96c   :  { %v942_v27 = vmul.f32 %v938_v24, %v934_v21  ;;  %v941_v28 = vmul.f32 %v936_v26, %v851_v16 }
 0x96e   :  { %v2655_v29 = vadd.f32 %v942_v27, %v941_v28 }
 0x96f   :  { %v940_v55 = vpop.permute.xlu1 %939 }
 0x970   :  { %1973 = vtanh.f32 %v2655_v29 }
 0x97d   :  { %v1974_v30 = vpop.eup %1973 }
 0x97e   :  { %v945_v22 = vmul.f32 %v1974_v30, %v940_v55 }
 0x980   :  { %1818 = vmatmul.mubr.f32.vlgmr.msra.gmra.mxu0 %v945_v22 }
 0x981   :  { %1856 = vmatpush3.msra.mxu0 %v1156_v0  ;;  %1887 = vmatprep.mubr.f32.mxu0 %v2424_v34  ;;  %v1147_v34 = vld [vmem:[#allocation7 + $0x30] sm:$0xff]  ;;  %v361_v0 = vadd.f32 %v2514_v57, %v2409_v60 }
 0x982   :  { %1857 = vmatprep.subr.mxu0 %v1155_v23 }
 0x983   :  { %1858 = vmatpush3.msra.mxu0 %v1155_v23 }
 0x984   :  { %1859 = vmatprep.subr.mxu0 %v1154_v25 }
 0x985   :  { %1860 = vmatpush3.msra.mxu0 %v1154_v25 }
 0x986   :  { %1861 = vmatprep.subr.mxu0 %v1153_v32 }
 0x987   :  { %1862 = vmatpush3.msra.mxu0 %v1153_v32 }
 0x988   :  { %1863 = vmatprep.subr.mxu0 %v1152_v33 }
 0x989   :  { %1864 = vmatpush3.msra.mxu0 %v1152_v33 }
 0x98a   :  { %1865 = vmatprep.subr.mxu0 %v1151_v35 }
 0x98b   :  { %1866 = vmatpush3.msra.mxu0 %v1151_v35 }
 0x98c   :  { %1867 = vmatprep.subr.mxu0 %v1150_v36 }
 0x98d   :  { %1868 = vmatpush3.msra.mxu0 %v1150_v36 }
 0x98e   :  { %1869 = vmatprep.subr.mxu0 %v1149_v37 }
 0x98f   :  { %1870 = vmatpush3.msra.mxu0 %v1149_v37 }
 0x990   :  { %1871 = vmatprep.subr.mxu0 %v1148_v38 }
 0x991   :  { %1872 = vmatpush3.msra.mxu0 %v1148_v38 }
 0x992   :  { %1873 = vmatprep.subr.mxu0 %v1147_v34 }
 0x993   :  { %1874 = vmatpush3.msra.mxu0 %v1147_v34 }
 0x994   :  { %1875 = vmatprep.subr.mxu0 %v1146_v39 }
 0x995   :  { %1876 = vmatpush3.msra.mxu0 %v1146_v39 }
 0x996   :  { %1877 = vmatprep.subr.mxu0 %v1145_v40 }
 0x997   :  { %1878 = vmatpush3.msra.mxu0 %v1145_v40 }
 0x998   :  { %1879 = vmatprep.subr.mxu0 %v1144_v41 }
 0x999   :  { %1880 = vmatpush3.msra.mxu0 %v1144_v41 }
 0x99a   :  { %1881 = vmatprep.subr.mxu0 %v1143_v42 }
 0x99b   :  { %1882 = vmatpush3.msra.mxu0 %v1143_v42 }
 0x99c   :  { %1883 = vmatprep.subr.mxu0 %v1142_v43 }
 0x99d   :  { %1884 = vmatpush3.msra.mxu0 %v1142_v43 }
 0x99e   :  { %1885 = vmatprep.subr.mxu0 %v1141_v44 }
 0x99f   :  { %1886 = vmatpush3.msra.mxu0 %v1141_v44 }
 0x9a0   :  { %1888 = vmatmul.mubr.f32.vlgmr.msra.gmra.mxu0 %v2471_v52  ;;  %v2668_v52 = vld [vmem:[%s2712_s9] ss:$0 sm:$0xff]  ;;  %s2124_s9 = smov [#allocation10]  }
 0x9a1   :  { %1890 = vmatprep.mubr.f32.mxu0 %v2525_v31  ;;  %s1303_s30 = sshll.u32 %s2124_s9, 4  ;;  %s1304_s30 = int_to_ptr.vmem [resolvable:$true] %s1303_s30 }
 0x9a2   :  { %s2047_s13 = scalar_lea.vmem %s1304_s30, 128  ;;  %p2052_p11 = scmp.lt.s32.totalorder %s1304_s30, %s1304_s30 }
 0x9a3   :  { %p2048_p10 = scmp.ne.s32.totalorder %s1304_s30, %s2047_s13  ;;  %p2053_p12 = scmp.lt.s32.totalorder %s2047_s13, %s2047_s13 }
 0x9a4   :  { %1891 = vmatmul.mubr.f32.gmra.mxu0 %v2569_v50 }
 0x9a5   :  { %1893 = vmatprep.mubr.f32.mxu0 %v2612_v20  ;;  %p2054_p13 = por %p2053_p12, %p2052_p11 }
 0x9a7   :  { %p2055_p0 = pnand %p2054_p13, %p2048_p10 }
 0x9a8   :  { %1894 = vmatmul.mubr.f32.gmra.mxu0 %v945_v22 }
 0xa40   :  { %v1014_v46 = vpop.f32.mrf.mxu0 }
 0xa41   :  { %v1018_v47 = vadd.f32 %v1014_v46, %v356_v45 }
 0xa42   :  { %v1819_v48 = vpop.f32.mrf.mxu0 }
 0xa43   :  { %v1354_v49 = vmul.f32 -1.442695, %v1018_v47 }
 0xa45   :  { %1975 = vpow2.f32 %v1354_v49 }
 0xa46   :  { %1977 = vtanh.f32 %v1018_v47 }
 0xa52   :  { %v1976_v51 = vpop.eup %1975 }
 0xa53   :  { %v1022_v53 = vadd.f32 1.0, %v1976_v51  ;;  %v1978_v50 = vpop.eup %1977 }
 0xa55   :  { %1979 = vrcp.f32 %v1022_v53 }
 0xa60   :  { %v1889_v31 = vpop.f32.mrf.mxu0 }
 0xa61   :  { %v1236_v54 = vadd.f32 %v1889_v31, %v2668_v52 }
 0xa62   :  { %v1980_v59 = vpop.eup %1979  ;;  %v1230_v58 = vpop.f32.mrf.mxu0 }
 0xa63   :  { %1981 = vtanh.f32 %v1236_v54  ;;  %v1231_v61 = vadd.f32 %v2668_v52, %v1230_v58  ;;  %v1026_v62 = vsel %vm2412_vm5, %v1978_v50, %v1980_v59 }
 0xa64   :  { %v1892_v63 = vpop.f32.mrf.mxu0  ;;  %1029 = vrot.lane.b32.xlu1 %v1026_v62, %s2123_s26  ;;  %1027 = vrot.lane.b32.xlu0 %v1026_v62, %s2122_s23 }
 0xa65   :  { %1983 = vtanh.f32 %v1231_v61  ;;  %v1246_v1 = vadd.f32 %v1892_v63, %v2668_v52 }
 0xa66   :  { %v1240_v2 = vpop.f32.mrf.mxu0 }
 0xa67   :  { %1985 = vtanh.f32 %v1246_v1  ;;  %v1241_v3 = vadd.f32 %v2668_v52, %v1240_v2 }
 0xa68   :  { %v1895_v56 = vpop.f32.mrf.mxu0  ;;  %1031 = vrot.lane.b32.xlu0 %v1026_v62, %s2121_s6 }
 0xa69   :  { %1987 = vtanh.f32 %v1241_v3  ;;  %v1256_v6 = vadd.f32 %v1895_v56, %v2668_v52 }
 0xa6a   :  { %v1250_v11 = vpop.f32.mrf.mxu0 }
 0xa6b   :  { %1989 = vtanh.f32 %v1256_v6  ;;  %v1251_v15 = vadd.f32 %v2668_v52, %v1250_v11 }
 0xa6d   :  { %1991 = vtanh.f32 %v1251_v15 }
 0xa70   :  { %v1982_v16 = vpop.eup %1981 }
 0xa71   :  { %1278 = vst [vmem:[#allocation9 + $0x8] sm:$0xff] %v1982_v16 }
 0xa72   :  { %v1984_v17 = vpop.eup %1983 }
 0xa73   :  { %1277 = vst [vmem:[#allocation9] sm:$0xff] %v1984_v17 }
 0xa74   :  { %v1986_v18 = vpop.eup %1985 }
 0xa75   :  { %1280 = vst [vmem:[#allocation9 + $0x18] sm:$0xff] %v1986_v18 }
 0xa76   :  { %v1988_v20 = vpop.eup %1987 }
 0xa77   :  { %1279 = vst [vmem:[#allocation9 + $0x10] sm:$0xff] %v1988_v20 }
 0xa78   :  { %v1990_v4 = vpop.eup %1989 }
 0xa79   :  { %1282 = vst [vmem:[#allocation9 + $0x28] sm:$0xff] %v1990_v4 }
 0xa7a   :  { %v1992_v5 = vpop.eup %1991 }
 0xa7b   :  { %1281 = vst [vmem:[#allocation9 + $0x20] sm:$0xff] %v1992_v5 }
 0xad6   :  { %v1030_v7 = vpop.permute.xlu1 %1029  ;;  %v1028_v8 = vpop.permute.xlu0 %1027 }
 0xad7   :  { %v1034_v9 = vmul.f32 %v1030_v7, %v1026_v62  ;;  %v1033_v10 = vmul.f32 %v1028_v8, %v2655_v29 }
 0xad9   :  { %v1035_v13 = vadd.f32 %v1034_v9, %v1033_v10 }
 0xada   :  { %v1032_v19 = vpop.permute.xlu0 %1031 }
 0xadb   :  { %1993 = vtanh.f32 %v1035_v13 }
 0xae8   :  { %v1994_v14 = vpop.eup %1993 }
 0xae9   :  { %v1037_v21 = vmul.f32 %v1994_v14, %v1032_v19 }
 0xaeb   :  { %1853 = vmatmul.mubr.f32.vlgmr.msra.gmra.mxu1 %v1037_v21  ;;  %1896 = vmatprep.mubr.f32.mxu0 %v1037_v21 }
 0xbab   :  { %v1106_v24 = vpop.f32.mrf.mxu1 }
 0xbac   :  { %v1110_v26 = vadd.f32 %v1106_v24, %v361_v0 }
 0xbad   :  { %v1854_v27 = vpop.f32.mrf.mxu1 }
 0xbae   :  { %v1355_v28 = vmul.f32 -1.442695, %v1110_v26 }
 0xbb0   :  { %1995 = vpow2.f32 %v1355_v28 }
 0xbb1   :  { %1997 = vtanh.f32 %v1110_v26 }
 0xbbd   :  { %v1996_v30 = vpop.eup %1995 }
 0xbbe   :  { %v1114_v55 = vadd.f32 1.0, %v1996_v30  ;;  %v1998_v29 = vpop.eup %1997 }
 0xbc0   :  { %1999 = vrcp.f32 %v1114_v55 }
 0xbcd   :  { %v2000_v22 = vpop.eup %1999 }
 0xbce   :  { %v1118_v23 = vsel %vm2412_vm5, %v1998_v29, %v2000_v22 }
 0xbcf   :  { %1121 = vrot.lane.b32.xlu0 %v1118_v23, %s2123_s26  ;;  %1119 = vrot.lane.b32.xlu1 %v1118_v23, %s2122_s23 }
 0xbd3   :  { %1123 = vrot.lane.b32.xlu1 %v1118_v23, %s2121_s6 }
 0xc41   :  { %v1122_v60 = vpop.permute.xlu0 %1121  ;;  %v1120_v57 = vpop.permute.xlu1 %1119 }
 0xc42   :  { %v1126_v25 = vmul.f32 %v1122_v60, %v1118_v23  ;;  %v1125_v32 = vmul.f32 %v1120_v57, %v1035_v13 }
 0xc44   :  { %v1127_v33 = vadd.f32 %v1126_v25, %v1125_v32 }
 0xc45   :  { %v1124_v36 = vpop.permute.xlu1 %1123 }
 0xc46   :  { %2001 = vtanh.f32 %v1127_v33  ;;  %1132 = vst [vmem:[#allocation12] sm:$0xff] %v1127_v33 }
 0xc53   :  { %v2002_v35 = vpop.eup %2001 }
 0xc54   :  { %v1129_v37 = vmul.f32 %v2002_v35, %v1124_v36 }
 0xc56   :  { %1131 = vst [vmem:[#allocation10] sm:$0xff] %v1129_v37  ;;  %1897 = vmatmul.mubr.f32.gmra.mxu0 %v1129_v37 }
 0xc57   :  { %2058 = shalt.err (!%p2055_p0)
}
 0xc58   :  { %1306 = dma.vmem_to_hbm [thread:$0]  %s1304_s30, 128, %s2714_s11, [#allocation11]  }
 0xc59   :  { %s2125_s15 = smov [#allocation12]  }
 0xc5a   :  { %s1313_s16 = sshll.u32 %s2125_s15, 4  ;;  %s1314_s16 = int_to_ptr.vmem [resolvable:$true] %s1313_s16 }
 0xc5b   :  { %s2067_s17 = scalar_lea.vmem %s1314_s16, 128  ;;  %p2072_p2 = scmp.lt.s32.totalorder %s1314_s16, %s1314_s16 }
 0xc5c   :  { %p2068_p1 = scmp.ne.s32.totalorder %s1314_s16, %s2067_s17  ;;  %p2073_p3 = scmp.lt.s32.totalorder %s2067_s17, %s2067_s17 }
 0xc5e   :  { %p2074_p4 = por %p2073_p3, %p2072_p2 }
 0xc60   :  { %p2075_p5 = pnand %p2074_p4, %p2068_p1 }
 0xc62   :  { %2078 = shalt.err (!%p2075_p5)
}
 0xc63   :  { %1316 = dma.vmem_to_hbm [thread:$0]  %s1314_s16, 128, %s2715_s12, [#allocation11]  }
 0xc64   :  { %s2126_s11 = smov [#allocation9]  }
 0xc65   :  { %s1290_s8 = sshll.u32 %s2126_s11, 4  ;;  %s1291_s8 = int_to_ptr.vmem [resolvable:$true] %s1290_s8 }
 0xc66   :  { %s2087_s20 = scalar_lea.vmem %s1291_s8, 1024  ;;  %p2092_p7 = scmp.lt.s32.totalorder %s1291_s8, %s1291_s8 }
 0xc67   :  { %p2088_p6 = scmp.ne.s32.totalorder %s1291_s8, %s2087_s20  ;;  %p2093_p8 = scmp.lt.s32.totalorder %s2087_s20, %s2087_s20 }
 0xc69   :  { %p2094_p9 = por %p2093_p8, %p2092_p7 }
 0xc6b   :  { %p2095_p10 = pnand %p2094_p9, %p2088_p6 }
 0xd16   :  { %v1898_v12 = vpop.f32.mrf.mxu0 }
 0xd17   :  { %v1266_v38 = vadd.f32 %v1898_v12, %v2668_v52 }
 0xd18   :  { %v1260_v34 = vpop.f32.mrf.mxu0 }
 0xd19   :  { %2003 = vtanh.f32 %v1266_v38  ;;  %v1261_v39 = vadd.f32 %v2668_v52, %v1260_v34 }
 0xd1b   :  { %2005 = vtanh.f32 %v1261_v39 }
 0xd26   :  { %v2004_v40 = vpop.eup %2003 }
 0xd27   :  { %1284 = vst [vmem:[#allocation9 + $0x38] sm:$0xff] %v2004_v40 }
 0xd28   :  { %v2006_v41 = vpop.eup %2005 }
 0xd29   :  { %1283 = vst [vmem:[#allocation9 + $0x30] sm:$0xff] %v2006_v41 }
 0xd2a   :  { %2098 = shalt.err (!%p2095_p10)
}
 0xd2b   :  { %1296 = dma.vmem_to_hbm [thread:$0]  %s1291_s8, 1024, %s2713_s10, [#allocation6], %s2116_s24, %s2116_s24, %s2117_s25  }
 0xd2c   :  { %2111 = dma.done.wait [#allocation6], 1024  }
 0xd2d   :  { %2112 = vsyncadd [#allocation6], 4294966272 }
 0xd2e   :  { %2113 = dma.done.wait [#allocation11], 256  }
 0xd2f   :  { %2114 = vsyncadd [#allocation11], 4294967040 }
 0xd30   :  { %1326 = vsyncpa [#allocation5], 1 }
 0xd31   :  { %1327 = vsyncpa [#allocation8], 1 }
 0xd32   :  { %1328 = vsyncpa [#allocation6], 1 }
 0xd33   :  { %1329 = vsyncpa [#allocation11], 1 }

</bundles_post_ra>
